<compile_context>
chip_gen: v7x
topology: tpu7x:2x2x1
jax: 0.10.0
libtpu: 0.0.40
codegen_flags: <defaults>
</compile_context>

<pallas_src>
import jax
import jax.numpy as jnp
from jax.experimental import pallas as pl
from jax.experimental.pallas import tpu as pltpu

# ----------------------------- configuration --------------------------------
LATENT_DIM = 32
DENSE_SIZES = (64, 32)          # dense_layer_sizes
RNN_LAYERS = 2                  # rnn_layer_count
RNN_SIZE = 32                   # rnn_layer_size (H)
SEQ_LEN = 8                     # sequence_length (small for the example)
JOINT_COUNT = 4
JOINT_DIM = 4
POSE_DIM = JOINT_COUNT * JOINT_DIM
BATCH = 2
BATCH_BLOCK = BATCH             # batch tile per grid step

LANES = 4 * RNN_SIZE            # 128 -- common lane width of the weight slab

# Row offsets inside the packed bf16 weight slab (all multiples of 16 so bf16
# sublane-packed tiles stay aligned).
_R_D0W = 0                      # (32, 128)  d0w  lane-padded (in 32 -> 64 real)
_R_D1W = 32                     # (128,128)  d1w  row+lane padded (64x32 real)
_R_IH0 = 160                    # (128,128)  wih0 row padded    (32x128 real)
_R_HH0 = 288                    # (32, 128)  whh0
_R_W1 = 320                     # (64, 128)  [wih1; whh1]  (fused layer-1 weight)
_R_FW = 384                     # (256,128)  kron(I_seq, fw)
_W_ROWS = 640


# ------------------------------- kernel -------------------------------------
def decoder_kernel(z_ref, w_ref, b_ref, out_ref):
    H = RNN_SIZE
    B = BATCH_BLOCK
    f32 = jnp.float32
    bf16 = jnp.bfloat16

    # ---- static weight views (bf16, 128 lanes each) ----
    d0w = w_ref[_R_D0W:_R_D0W + 32, :]
    d1w = w_ref[_R_D1W:_R_D1W + 128, :]
    wih0 = w_ref[_R_IH0:_R_IH0 + 128, :]
    whh0 = w_ref[_R_HH0:_R_HH0 + 32, :]
    w1 = w_ref[_R_W1:_R_W1 + 64, :]
    fw = w_ref[_R_FW:_R_FW + 256, :]

    # ---- biases (f32), loaded once ----
    b_all = b_ref[...]
    d0b = b_all[0:1, :]
    d1b = b_all[1:2, :]
    b0 = b_all[2:3, :]
    fb = b_all[4:5, :]
    # Hoisted: JAX does not CSE broadcast_in_dim, so do it once, not per step.
    b1b = jnp.broadcast_to(b_all[3:4, :], (B, 4 * H))

    # ---- dense MLP (lane-padded to 128; padded lanes stay exactly zero) ----
    x = jnp.maximum(
        jnp.dot(z_ref[...].astype(bf16), d0w, preferred_element_type=f32) + d0b,
        0.0)
    x = jnp.maximum(
        jnp.dot(x.astype(bf16), d1w, preferred_element_type=f32) + d1b,
        0.0)

    # Loop-invariant layer-0 input projection (MLP output is repeated per step).
    ih0 = jnp.dot(x.astype(bf16), wih0, preferred_element_type=f32) + b0  # (B,4H)

    # ---- prologue: layer-0 cell at t=0 (h0=c0=0 => pre-activation == ih0) ----
    sg = jax.nn.sigmoid(ih0)
    th = jnp.tanh(ih0)
    c0 = sg[:, 0:H] * th[:, 2 * H:3 * H]                 # f*0 + i*g
    h0 = sg[:, 3 * H:4 * H] * jnp.tanh(c0)               # h0[0]

    c1 = jnp.zeros((B, H), f32)
    h1 = jnp.zeros((B, H), f32)
    h1_steps = []

    # ---- wavefront loop: combined step computes layer0[t+1] and layer1[t] ----
    # Both depend only on h0[t]; pack their gate pre-activations sublane-wise so
    # sigmoid/tanh are a single EUP push each per combined step.
    for t in range(SEQ_LEN - 1):
        h0b = h0.astype(bf16)
        hh = jnp.concatenate([h0b, h1.astype(bf16)], axis=1)           # (B,2H)
        g0 = ih0 + jnp.dot(h0b, whh0, preferred_element_type=f32)      # layer0, t+1
        g1 = b1b + jnp.dot(hh, w1, preferred_element_type=f32)         # layer1, t
        g = jnp.concatenate([g0, g1], axis=0)                          # (2B,4H)
        sg = jax.nn.sigmoid(g)
        th = jnp.tanh(g)
        c0 = sg[:B, H:2 * H] * c0 + sg[:B, 0:H] * th[:B, 2 * H:3 * H]
        c1 = sg[B:, H:2 * H] * c1 + sg[B:, 0:H] * th[B:, 2 * H:3 * H]
        tc = jnp.tanh(jnp.concatenate([c0, c1], axis=0))               # one EUP push
        h0 = sg[:B, 3 * H:4 * H] * tc[:B]                              # h0[t+1]
        h1 = sg[B:, 3 * H:4 * H] * tc[B:]                              # h1[t]
        h1_steps.append(h1)

    # ---- epilogue: layer-1 cell at t = SEQ_LEN-1 ----
    hh = jnp.concatenate([h0.astype(bf16), h1.astype(bf16)], axis=1)
    g1 = b1b + jnp.dot(hh, w1, preferred_element_type=f32)
    sg = jax.nn.sigmoid(g1)
    th = jnp.tanh(g1)
    c1 = sg[:, H:2 * H] * c1 + sg[:, 0:H] * th[:, 2 * H:3 * H]
    h1 = sg[:, 3 * H:4 * H] * jnp.tanh(c1)
    h1_steps.append(h1)

    # ---- deferred projection: (B, SEQ*H) @ kron(I_seq, fw) + tiled bias ----
    # h1 history lives in vregs; one lane-dense 128-wide output store.
    h_all = jnp.concatenate(h1_steps, axis=1).astype(bf16)             # (B, SEQ*H)
    out_ref[...] = jnp.dot(h_all, fw, preferred_element_type=f32) + fb


# ------------------------------ wrapper --------------------------------------
@jax.jit
def decoder_forward(z, w_slab, b_slab):
    out = pl.pallas_call(
        decoder_kernel,
        out_shape=jax.ShapeDtypeStruct((BATCH, SEQ_LEN * POSE_DIM), jnp.float32),
        grid=(BATCH // BATCH_BLOCK,),
        in_specs=[
            pl.BlockSpec((BATCH_BLOCK, LATENT_DIM), lambda b: (b, 0)),
            pl.BlockSpec((_W_ROWS, LANES), lambda b: (0, 0)),
            pl.BlockSpec((5, LANES), lambda b: (0, 0)),
        ],
        out_specs=pl.BlockSpec((BATCH_BLOCK, SEQ_LEN * POSE_DIM), lambda b: (b, 0)),
        compiler_params=pltpu.CompilerParams(dimension_semantics=("arbitrary",)),
    )(z, w_slab, b_slab)
    # (B, SEQ*POSE) -> (B, SEQ, POSE): contiguous reshape, no transpose needed.
    return out.reshape(BATCH, SEQ_LEN, POSE_DIM)


# ------------------- parameter packing (outside the jitted call) -------------
def prepare_params(params):
    """Pack the 12 raw parameters into one bf16 weight slab + one f32 bias slab.

    Done once at parameter-preparation time so kron/tile/pad cost is not paid
    per call, and the kernel sees only 3 inputs (3 DMA descriptors).
    """
    (d0w, d0b, d1w, d1b,
     wih0, whh0, b0,
     wih1, whh1, b1,
     fw, fb) = params

    def pad_to(a, rows, cols):
        return jnp.pad(a, ((0, rows - a.shape[0]), (0, cols - a.shape[1])))

    d0w_p = pad_to(d0w, 32, LANES)                       # lane-pad 64 -> 128
    d1w_p = pad_to(d1w, 128, LANES)                      # row+lane pad (zeros)
    wih0_p = pad_to(wih0, 128, LANES)                    # row pad (zeros)
    w1_cat = jnp.concatenate([wih1, whh1], axis=0)       # fused layer-1 weight
    fw_big = jnp.kron(jnp.eye(SEQ_LEN, dtype=fw.dtype), fw)   # (SEQ*H, SEQ*POSE)

    w_slab = jnp.concatenate(
        [d0w_p, d1w_p, wih0_p, whh0, w1_cat, fw_big], axis=0).astype(jnp.bfloat16)
    assert w_slab.shape == (_W_ROWS, LANES)

    b_slab = jnp.concatenate(
        [pad_to(d0b, 1, LANES),
         pad_to(d1b, 1, LANES),
         b0, b1,
         jnp.tile(fb, (1, SEQ_LEN))], axis=0).astype(jnp.float32)      # (5, 128)

    return w_slab, b_slab


# ------------------------- pure-JAX reference --------------------------------
def decoder_reference(z, params):
    (d0w, d0b, d1w, d1b,
     wih0, whh0, b0,
     wih1, whh1, b1,
     fw, fb) = params
    H = RNN_SIZE

    x = jnp.maximum(z @ d0w + d0b, 0.0)
    x = jnp.maximum(x @ d1w + d1b, 0.0)

    def cell(inp, h, c, wih, whh, b):
        g = inp @ wih + h @ whh + b
        i, f, gg, o = (jax.nn.sigmoid(g[:, :H]),
                       jax.nn.sigmoid(g[:, H:2 * H]),
                       jnp.tanh(g[:, 2 * H:3 * H]),
                       jax.nn.sigmoid(g[:, 3 * H:]))
        c_new = f * c + i * gg
        return o * jnp.tanh(c_new), c_new

    h0 = jnp.zeros((BATCH, H)); c0 = jnp.zeros((BATCH, H))
    h1 = jnp.zeros((BATCH, H)); c1 = jnp.zeros((BATCH, H))
    outs = []
    for _ in range(SEQ_LEN):
        h0, c0 = cell(x, h0, c0, wih0, whh0, b0)
        h1, c1 = cell(h0, h1, c1, wih1, whh1, b1)
        outs.append(h1 @ fw + fb)
    return jnp.stack(outs, axis=1)


# ------------------------- deterministic params ------------------------------
def make_params(key):
    ks = list(jax.random.split(key, 32))
    ki = iter(ks)

    def uniform(shape, bound):
        return jax.random.uniform(next(ki), shape, jnp.float32, -bound, bound)

    # dense layers (stored pre-transposed: (in, out)), PyTorch init U(-1/sqrt(fan_in), ..)
    d0w = uniform((LATENT_DIM, DENSE_SIZES[0]), 1.0 / jnp.sqrt(LATENT_DIM))
    d0b = uniform((1, DENSE_SIZES[0]), 1.0 / jnp.sqrt(LATENT_DIM))
    d1w = uniform((DENSE_SIZES[0], DENSE_SIZES[1]), 1.0 / jnp.sqrt(DENSE_SIZES[0]))
    d1b = uniform((1, DENSE_SIZES[1]), 1.0 / jnp.sqrt(DENSE_SIZES[0]))

    # LSTM layers, PyTorch init U(-1/sqrt(H), 1/sqrt(H)); gate order i,f,g,o
    k = 1.0 / jnp.sqrt(RNN_SIZE)
    wih0 = uniform((DENSE_SIZES[-1], 4 * RNN_SIZE), k)
    whh0 = uniform((RNN_SIZE, 4 * RNN_SIZE), k)
    b0 = uniform((1, 4 * RNN_SIZE), k) + uniform((1, 4 * RNN_SIZE), k)   # b_ih + b_hh
    wih1 = uniform((RNN_SIZE, 4 * RNN_SIZE), k)
    whh1 = uniform((RNN_SIZE, 4 * RNN_SIZE), k)
    b1 = uniform((1, 4 * RNN_SIZE), k) + uniform((1, 4 * RNN_SIZE), k)

    # final linear
    fw = uniform((RNN_SIZE, POSE_DIM), k)
    fb = uniform((1, POSE_DIM), k)

    return (d0w, d0b, d1w, d1b, wih0, whh0, b0, wih1, whh1, b1, fw, fb)


if __name__ == "__main__":
    key = jax.random.PRNGKey(0)
    pkey, zkey = jax.random.split(key)
    params = make_params(pkey)
    w_slab, b_slab = prepare_params(params)
    z = jax.random.normal(zkey, (BATCH, LATENT_DIM), jnp.float32)

    out = jax.block_until_ready(decoder_forward(z, w_slab, b_slab))
    assert out.shape == (BATCH, SEQ_LEN, POSE_DIM), out.shape

    ref = jax.block_until_ready(decoder_reference(z, params))
    # bf16 MXU operands (f32 accumulate/elementwise) -> ~1e-2 worst-case drift.
    assert jnp.allclose(out, ref, atol=3e-2, rtol=3e-2), float(jnp.max(jnp.abs(out - ref)))

    print("KERNEL_OK")
</pallas_src>

<mosaic_0001>
module attributes {stable_mosaic.version = 11 : i64} {
  func.func @decoder_kernel(%arg0: i32, %arg1: memref<2x32xf32, #tpu.memory_space<vmem>>, %arg2: memref<640x128xbf16, #tpu.memory_space<vmem>>, %arg3: memref<5x128xf32, #tpu.memory_space<vmem>>, %arg4: memref<2x128xf32, #tpu.memory_space<vmem>>) attributes {dimension_semantics = [#tpu.dimension_semantics<arbitrary>], iteration_bounds = array<i64: 1>, scalar_prefetch = 0 : i64, scratch_operands = 0 : i64, tpu.core_type = #tpu.core_type<tc>, window_params = [{transform_indices = @transform_0, window_bounds = array<i64: 2, 32>}, {pipeline_mode = #tpu.pipeline_mode<synchronous>, transform_indices = @transform_1, window_bounds = array<i64: 640, 128>}, {pipeline_mode = #tpu.pipeline_mode<synchronous>, transform_indices = @transform_2, window_bounds = array<i64: 5, 128>}, {transform_indices = @transform_3, window_bounds = array<i64: 2, 128>}]} {
    %c0 = arith.constant 0 : index
    %c0_0 = arith.constant 0 : index
    %0 = vector.load %arg2[%c0, %c0_0] : memref<640x128xbf16, #tpu.memory_space<vmem>>, vector<32x128xbf16>
    %c32 = arith.constant 32 : index
    %c0_1 = arith.constant 0 : index
    %1 = vector.load %arg2[%c32, %c0_1] : memref<640x128xbf16, #tpu.memory_space<vmem>>, vector<128x128xbf16>
    %c160 = arith.constant 160 : index
    %c0_2 = arith.constant 0 : index
    %2 = vector.load %arg2[%c160, %c0_2] : memref<640x128xbf16, #tpu.memory_space<vmem>>, vector<128x128xbf16>
    %c288 = arith.constant 288 : index
    %c0_3 = arith.constant 0 : index
    %3 = vector.load %arg2[%c288, %c0_3] : memref<640x128xbf16, #tpu.memory_space<vmem>>, vector<32x128xbf16>
    %c320 = arith.constant 320 : index
    %c0_4 = arith.constant 0 : index
    %4 = vector.load %arg2[%c320, %c0_4] : memref<640x128xbf16, #tpu.memory_space<vmem>>, vector<64x128xbf16>
    %c384 = arith.constant 384 : index
    %c0_5 = arith.constant 0 : index
    %5 = vector.load %arg2[%c384, %c0_5] : memref<640x128xbf16, #tpu.memory_space<vmem>>, vector<256x128xbf16>
    %c0_6 = arith.constant 0 : index
    %c0_7 = arith.constant 0 : index
    %6 = vector.load %arg3[%c0_6, %c0_7] : memref<5x128xf32, #tpu.memory_space<vmem>>, vector<5x128xf32>
    %7 = vector.extract_strided_slice %6 {offsets = [0, 0], sizes = [1, 128], strides = [1, 1]} : vector<5x128xf32> to vector<1x128xf32>
    %8 = vector.extract_strided_slice %6 {offsets = [1, 0], sizes = [1, 128], strides = [1, 1]} : vector<5x128xf32> to vector<1x128xf32>
    %9 = vector.extract_strided_slice %6 {offsets = [2, 0], sizes = [1, 128], strides = [1, 1]} : vector<5x128xf32> to vector<1x128xf32>
    %10 = vector.extract_strided_slice %6 {offsets = [4, 0], sizes = [1, 128], strides = [1, 1]} : vector<5x128xf32> to vector<1x128xf32>
    %11 = vector.extract_strided_slice %6 {offsets = [3, 0], sizes = [1, 128], strides = [1, 1]} : vector<5x128xf32> to vector<1x128xf32>
    %12 = vector.shape_cast %11 : vector<1x128xf32> to vector<1x128xf32>
    %13 = vector.broadcast %12 : vector<1x128xf32> to vector<2x128xf32>
    %c0_8 = arith.constant 0 : index
    %c0_9 = arith.constant 0 : index
    %14 = vector.load %arg1[%c0_8, %c0_9] : memref<2x32xf32, #tpu.memory_space<vmem>>, vector<2x32xf32>
    %15 = arith.truncf %14 : vector<2x32xf32> to vector<2x32xbf16>
    %cst = arith.constant dense<0.000000e+00> : vector<2x128xf32>
    %16 = tpu.matmul %15, %0, %cst {dimension_numbers = #tpu.dot_dimension_numbers<[1], [0], [0], [1], [0, 0, 1, 1], [], []>} : vector<2x32xbf16>, vector<32x128xbf16>, vector<2x128xf32> -> vector<2x128xf32>
    %17 = vector.broadcast %7 : vector<1x128xf32> to vector<2x128xf32>
    %18 = arith.addf %16, %17 : vector<2x128xf32>
    %cst_10 = arith.constant 0.000000e+00 : f32
    %19 = vector.broadcast %cst_10 : f32 to vector<2x128xf32>
    %20 = arith.maximumf %18, %19 : vector<2x128xf32>
    %21 = arith.truncf %20 : vector<2x128xf32> to vector<2x128xbf16>
    %cst_11 = arith.constant dense<0.000000e+00> : vector<2x128xf32>
    %22 = tpu.matmul %21, %1, %cst_11 {dimension_numbers = #tpu.dot_dimension_numbers<[1], [0], [0], [1], [0, 0, 1, 1], [], []>} : vector<2x128xbf16>, vector<128x128xbf16>, vector<2x128xf32> -> vector<2x128xf32>
    %23 = vector.broadcast %8 : vector<1x128xf32> to vector<2x128xf32>
    %24 = arith.addf %22, %23 : vector<2x128xf32>
    %cst_12 = arith.constant 0.000000e+00 : f32
    %25 = vector.broadcast %cst_12 : f32 to vector<2x128xf32>
    %26 = arith.maximumf %24, %25 : vector<2x128xf32>
    %27 = arith.truncf %26 : vector<2x128xf32> to vector<2x128xbf16>
    %cst_13 = arith.constant dense<0.000000e+00> : vector<2x128xf32>
    %28 = tpu.matmul %27, %2, %cst_13 {dimension_numbers = #tpu.dot_dimension_numbers<[1], [0], [0], [1], [0, 0, 1, 1], [], []>} : vector<2x128xbf16>, vector<128x128xbf16>, vector<2x128xf32> -> vector<2x128xf32>
    %29 = vector.broadcast %9 : vector<1x128xf32> to vector<2x128xf32>
    %30 = arith.addf %28, %29 : vector<2x128xf32>
    %31 = arith.negf %30 : vector<2x128xf32>
    %32 = math.exp %31 : vector<2x128xf32>
    %cst_14 = arith.constant 1.000000e+00 : f32
    %33 = vector.broadcast %cst_14 : f32 to vector<2x128xf32>
    %34 = arith.addf %33, %32 : vector<2x128xf32>
    %35 = arith.divf %33, %34 : vector<2x128xf32>
    %36 = math.tanh %30 : vector<2x128xf32>
    %37 = vector.extract_strided_slice %35 {offsets = [0, 0], sizes = [2, 32], strides = [1, 1]} : vector<2x128xf32> to vector<2x32xf32>
    %38 = vector.extract_strided_slice %36 {offsets = [0, 64], sizes = [2, 32], strides = [1, 1]} : vector<2x128xf32> to vector<2x32xf32>
    %39 = arith.mulf %37, %38 : vector<2x32xf32>
    %40 = vector.extract_strided_slice %35 {offsets = [0, 96], sizes = [2, 32], strides = [1, 1]} : vector<2x128xf32> to vector<2x32xf32>
    %41 = math.tanh %39 : vector<2x32xf32>
    %42 = arith.mulf %40, %41 : vector<2x32xf32>
    %cst_15 = arith.constant 0.000000e+00 : f32
    %43 = vector.broadcast %cst_15 : f32 to vector<2x32xf32>
    %cst_16 = arith.constant 0.000000e+00 : f32
    %44 = vector.broadcast %cst_16 : f32 to vector<2x32xf32>
    %45 = arith.truncf %42 : vector<2x32xf32> to vector<2x32xbf16>
    %46 = arith.truncf %44 : vector<2x32xf32> to vector<2x32xbf16>
    %47 = tpu.concatenate %45, %46 in 1 : vector<2x32xbf16>, vector<2x32xbf16> -> vector<2x64xbf16>
    %cst_17 = arith.constant dense<0.000000e+00> : vector<2x128xf32>
    %48 = tpu.matmul %45, %3, %cst_17 {dimension_numbers = #tpu.dot_dimension_numbers<[1], [0], [0], [1], [0, 0, 1, 1], [], []>} : vector<2x32xbf16>, vector<32x128xbf16>, vector<2x128xf32> -> vector<2x128xf32>
    %49 = arith.addf %30, %48 : vector<2x128xf32>
    %cst_18 = arith.constant dense<0.000000e+00> : vector<2x128xf32>
    %50 = tpu.matmul %47, %4, %cst_18 {dimension_numbers = #tpu.dot_dimension_numbers<[1], [0], [0], [1], [0, 0, 1, 1], [], []>} : vector<2x64xbf16>, vector<64x128xbf16>, vector<2x128xf32> -> vector<2x128xf32>
    %51 = arith.addf %13, %50 : vector<2x128xf32>
    %52 = tpu.concatenate %49, %51 in 0 : vector<2x128xf32>, vector<2x128xf32> -> vector<4x128xf32>
    %53 = arith.negf %52 : vector<4x128xf32>
    %54 = math.exp %53 : vector<4x128xf32>
    %cst_19 = arith.constant 1.000000e+00 : f32
    %55 = vector.broadcast %cst_19 : f32 to vector<4x128xf32>
    %56 = arith.addf %55, %54 : vector<4x128xf32>
    %57 = arith.divf %55, %56 : vector<4x128xf32>
    %58 = math.tanh %52 : vector<4x128xf32>
    %59 = vector.extract_strided_slice %57 {offsets = [0, 32], sizes = [2, 32], strides = [1, 1]} : vector<4x128xf32> to vector<2x32xf32>
    %60 = arith.mulf %59, %39 : vector<2x32xf32>
    %61 = vector.extract_strided_slice %57 {offsets = [0, 0], sizes = [2, 32], strides = [1, 1]} : vector<4x128xf32> to vector<2x32xf32>
    %62 = vector.extract_strided_slice %58 {offsets = [0, 64], sizes = [2, 32], strides = [1, 1]} : vector<4x128xf32> to vector<2x32xf32>
    %63 = arith.mulf %61, %62 : vector<2x32xf32>
    %64 = arith.addf %60, %63 : vector<2x32xf32>
    %65 = vector.extract_strided_slice %57 {offsets = [2, 32], sizes = [2, 32], strides = [1, 1]} : vector<4x128xf32> to vector<2x32xf32>
    %66 = arith.mulf %65, %43 : vector<2x32xf32>
    %67 = vector.extract_strided_slice %57 {offsets = [2, 0], sizes = [2, 32], strides = [1, 1]} : vector<4x128xf32> to vector<2x32xf32>
    %68 = vector.extract_strided_slice %58 {offsets = [2, 64], sizes = [2, 32], strides = [1, 1]} : vector<4x128xf32> to vector<2x32xf32>
    %69 = arith.mulf %67, %68 : vector<2x32xf32>
    %70 = arith.addf %66, %69 : vector<2x32xf32>
    %71 = tpu.concatenate %64, %70 in 0 : vector<2x32xf32>, vector<2x32xf32> -> vector<4x32xf32>
    %72 = math.tanh %71 : vector<4x32xf32>
    %73 = vector.extract_strided_slice %57 {offsets = [0, 96], sizes = [2, 32], strides = [1, 1]} : vector<4x128xf32> to vector<2x32xf32>
    %74 = vector.extract_strided_slice %72 {offsets = [0, 0], sizes = [2, 32], strides = [1, 1]} : vector<4x32xf32> to vector<2x32xf32>
    %75 = arith.mulf %73, %74 : vector<2x32xf32>
    %76 = vector.extract_strided_slice %57 {offsets = [2, 96], sizes = [2, 32], strides = [1, 1]} : vector<4x128xf32> to vector<2x32xf32>
    %77 = vector.extract_strided_slice %72 {offsets = [2, 0], sizes = [2, 32], strides = [1, 1]} : vector<4x32xf32> to vector<2x32xf32>
    %78 = arith.mulf %76, %77 : vector<2x32xf32>
    %79 = arith.truncf %75 : vector<2x32xf32> to vector<2x32xbf16>
    %80 = arith.truncf %78 : vector<2x32xf32> to vector<2x32xbf16>
    %81 = tpu.concatenate %79, %80 in 1 : vector<2x32xbf16>, vector<2x32xbf16> -> vector<2x64xbf16>
    %cst_20 = arith.constant dense<0.000000e+00> : vector<2x128xf32>
    %82 = tpu.matmul %79, %3, %cst_20 {dimension_numbers = #tpu.dot_dimension_numbers<[1], [0], [0], [1], [0, 0, 1, 1], [], []>} : vector<2x32xbf16>, vector<32x128xbf16>, vector<2x128xf32> -> vector<2x128xf32>
    %83 = arith.addf %30, %82 : vector<2x128xf32>
    %cst_21 = arith.constant dense<0.000000e+00> : vector<2x128xf32>
    %84 = tpu.matmul %81, %4, %cst_21 {dimension_numbers = #tpu.dot_dimension_numbers<[1], [0], [0], [1], [0, 0, 1, 1], [], []>} : vector<2x64xbf16>, vector<64x128xbf16>, vector<2x128xf32> -> vector<2x128xf32>
    %85 = arith.addf %13, %84 : vector<2x128xf32>
    %86 = tpu.concatenate %83, %85 in 0 : vector<2x128xf32>, vector<2x128xf32> -> vector<4x128xf32>
    %87 = arith.negf %86 : vector<4x128xf32>
    %88 = math.exp %87 : vector<4x128xf32>
    %cst_22 = arith.constant 1.000000e+00 : f32
    %89 = vector.broadcast %cst_22 : f32 to vector<4x128xf32>
    %90 = arith.addf %89, %88 : vector<4x128xf32>
    %91 = arith.divf %89, %90 : vector<4x128xf32>
    %92 = math.tanh %86 : vector<4x128xf32>
    %93 = vector.extract_strided_slice %91 {offsets = [0, 32], sizes = [2, 32], strides = [1, 1]} : vector<4x128xf32> to vector<2x32xf32>
    %94 = arith.mulf %93, %64 : vector<2x32xf32>
    %95 = vector.extract_strided_slice %91 {offsets = [0, 0], sizes = [2, 32], strides = [1, 1]} : vector<4x128xf32> to vector<2x32xf32>
    %96 = vector.extract_strided_slice %92 {offsets = [0, 64], sizes = [2, 32], strides = [1, 1]} : vector<4x128xf32> to vector<2x32xf32>
    %97 = arith.mulf %95, %96 : vector<2x32xf32>
    %98 = arith.addf %94, %97 : vector<2x32xf32>
    %99 = vector.extract_strided_slice %91 {offsets = [2, 32], sizes = [2, 32], strides = [1, 1]} : vector<4x128xf32> to vector<2x32xf32>
    %100 = arith.mulf %99, %70 : vector<2x32xf32>
    %101 = vector.extract_strided_slice %91 {offsets = [2, 0], sizes = [2, 32], strides = [1, 1]} : vector<4x128xf32> to vector<2x32xf32>
    %102 = vector.extract_strided_slice %92 {offsets = [2, 64], sizes = [2, 32], strides = [1, 1]} : vector<4x128xf32> to vector<2x32xf32>
    %103 = arith.mulf %101, %102 : vector<2x32xf32>
    %104 = arith.addf %100, %103 : vector<2x32xf32>
    %105 = tpu.concatenate %98, %104 in 0 : vector<2x32xf32>, vector<2x32xf32> -> vector<4x32xf32>
    %106 = math.tanh %105 : vector<4x32xf32>
    %107 = vector.extract_strided_slice %91 {offsets = [0, 96], sizes = [2, 32], strides = [1, 1]} : vector<4x128xf32> to vector<2x32xf32>
    %108 = vector.extract_strided_slice %106 {offsets = [0, 0], sizes = [2, 32], strides = [1, 1]} : vector<4x32xf32> to vector<2x32xf32>
    %109 = arith.mulf %107, %108 : vector<2x32xf32>
    %110 = vector.extract_strided_slice %91 {offsets = [2, 96], sizes = [2, 32], strides = [1, 1]} : vector<4x128xf32> to vector<2x32xf32>
    %111 = vector.extract_strided_slice %106 {offsets = [2, 0], sizes = [2, 32], strides = [1, 1]} : vector<4x32xf32> to vector<2x32xf32>
    %112 = arith.mulf %110, %111 : vector<2x32xf32>
    %113 = arith.truncf %109 : vector<2x32xf32> to vector<2x32xbf16>
    %114 = arith.truncf %112 : vector<2x32xf32> to vector<2x32xbf16>
    %115 = tpu.concatenate %113, %114 in 1 : vector<2x32xbf16>, vector<2x32xbf16> -> vector<2x64xbf16>
    %cst_23 = arith.constant dense<0.000000e+00> : vector<2x128xf32>
    %116 = tpu.matmul %113, %3, %cst_23 {dimension_numbers = #tpu.dot_dimension_numbers<[1], [0], [0], [1], [0, 0, 1, 1], [], []>} : vector<2x32xbf16>, vector<32x128xbf16>, vector<2x128xf32> -> vector<2x128xf32>
    %117 = arith.addf %30, %116 : vector<2x128xf32>
    %cst_24 = arith.constant dense<0.000000e+00> : vector<2x128xf32>
    %118 = tpu.matmul %115, %4, %cst_24 {dimension_numbers = #tpu.dot_dimension_numbers<[1], [0], [0], [1], [0, 0, 1, 1], [], []>} : vector<2x64xbf16>, vector<64x128xbf16>, vector<2x128xf32> -> vector<2x128xf32>
    %119 = arith.addf %13, %118 : vector<2x128xf32>
    %120 = tpu.concatenate %117, %119 in 0 : vector<2x128xf32>, vector<2x128xf32> -> vector<4x128xf32>
    %121 = arith.negf %120 : vector<4x128xf32>
    %122 = math.exp %121 : vector<4x128xf32>
    %cst_25 = arith.constant 1.000000e+00 : f32
    %123 = vector.broadcast %cst_25 : f32 to vector<4x128xf32>
    %124 = arith.addf %123, %122 : vector<4x128xf32>
    %125 = arith.divf %123, %124 : vector<4x128xf32>
    %126 = math.tanh %120 : vector<4x128xf32>
    %127 = vector.extract_strided_slice %125 {offsets = [0, 32], sizes = [2, 32], strides = [1, 1]} : vector<4x128xf32> to vector<2x32xf32>
    %128 = arith.mulf %127, %98 : vector<2x32xf32>
    %129 = vector.extract_strided_slice %125 {offsets = [0, 0], sizes = [2, 32], strides = [1, 1]} : vector<4x128xf32> to vector<2x32xf32>
    %130 = vector.extract_strided_slice %126 {offsets = [0, 64], sizes = [2, 32], strides = [1, 1]} : vector<4x128xf32> to vector<2x32xf32>
    %131 = arith.mulf %129, %130 : vector<2x32xf32>
    %132 = arith.addf %128, %131 : vector<2x32xf32>
    %133 = vector.extract_strided_slice %125 {offsets = [2, 32], sizes = [2, 32], strides = [1, 1]} : vector<4x128xf32> to vector<2x32xf32>
    %134 = arith.mulf %133, %104 : vector<2x32xf32>
    %135 = vector.extract_strided_slice %125 {offsets = [2, 0], sizes = [2, 32], strides = [1, 1]} : vector<4x128xf32> to vector<2x32xf32>
    %136 = vector.extract_strided_slice %126 {offsets = [2, 64], sizes = [2, 32], strides = [1, 1]} : vector<4x128xf32> to vector<2x32xf32>
    %137 = arith.mulf %135, %136 : vector<2x32xf32>
    %138 = arith.addf %134, %137 : vector<2x32xf32>
    %139 = tpu.concatenate %132, %138 in 0 : vector<2x32xf32>, vector<2x32xf32> -> vector<4x32xf32>
    %140 = math.tanh %139 : vector<4x32xf32>
    %141 = vector.extract_strided_slice %125 {offsets = [0, 96], sizes = [2, 32], strides = [1, 1]} : vector<4x128xf32> to vector<2x32xf32>
    %142 = vector.extract_strided_slice %140 {offsets = [0, 0], sizes = [2, 32], strides = [1, 1]} : vector<4x32xf32> to vector<2x32xf32>
    %143 = arith.mulf %141, %142 : vector<2x32xf32>
    %144 = vector.extract_strided_slice %125 {offsets = [2, 96], sizes = [2, 32], strides = [1, 1]} : vector<4x128xf32> to vector<2x32xf32>
    %145 = vector.extract_strided_slice %140 {offsets = [2, 0], sizes = [2, 32], strides = [1, 1]} : vector<4x32xf32> to vector<2x32xf32>
    %146 = arith.mulf %144, %145 : vector<2x32xf32>
    %147 = arith.truncf %143 : vector<2x32xf32> to vector<2x32xbf16>
    %148 = arith.truncf %146 : vector<2x32xf32> to vector<2x32xbf16>
    %149 = tpu.concatenate %147, %148 in 1 : vector<2x32xbf16>, vector<2x32xbf16> -> vector<2x64xbf16>
    %cst_26 = arith.constant dense<0.000000e+00> : vector<2x128xf32>
    %150 = tpu.matmul %147, %3, %cst_26 {dimension_numbers = #tpu.dot_dimension_numbers<[1], [0], [0], [1], [0, 0, 1, 1], [], []>} : vector<2x32xbf16>, vector<32x128xbf16>, vector<2x128xf32> -> vector<2x128xf32>
    %151 = arith.addf %30, %150 : vector<2x128xf32>
    %cst_27 = arith.constant dense<0.000000e+00> : vector<2x128xf32>
    %152 = tpu.matmul %149, %4, %cst_27 {dimension_numbers = #tpu.dot_dimension_numbers<[1], [0], [0], [1], [0, 0, 1, 1], [], []>} : vector<2x64xbf16>, vector<64x128xbf16>, vector<2x128xf32> -> vector<2x128xf32>
    %153 = arith.addf %13, %152 : vector<2x128xf32>
    %154 = tpu.concatenate %151, %153 in 0 : vector<2x128xf32>, vector<2x128xf32> -> vector<4x128xf32>
    %155 = arith.negf %154 : vector<4x128xf32>
    %156 = math.exp %155 : vector<4x128xf32>
    %cst_28 = arith.constant 1.000000e+00 : f32
    %157 = vector.broadcast %cst_28 : f32 to vector<4x128xf32>
    %158 = arith.addf %157, %156 : vector<4x128xf32>
    %159 = arith.divf %157, %158 : vector<4x128xf32>
    %160 = math.tanh %154 : vector<4x128xf32>
    %161 = vector.extract_strided_slice %159 {offsets = [0, 32], sizes = [2, 32], strides = [1, 1]} : vector<4x128xf32> to vector<2x32xf32>
    %162 = arith.mulf %161, %132 : vector<2x32xf32>
    %163 = vector.extract_strided_slice %159 {offsets = [0, 0], sizes = [2, 32], strides = [1, 1]} : vector<4x128xf32> to vector<2x32xf32>
    %164 = vector.extract_strided_slice %160 {offsets = [0, 64], sizes = [2, 32], strides = [1, 1]} : vector<4x128xf32> to vector<2x32xf32>
    %165 = arith.mulf %163, %164 : vector<2x32xf32>
    %166 = arith.addf %162, %165 : vector<2x32xf32>
    %167 = vector.extract_strided_slice %159 {offsets = [2, 32], sizes = [2, 32], strides = [1, 1]} : vector<4x128xf32> to vector<2x32xf32>
    %168 = arith.mulf %167, %138 : vector<2x32xf32>
    %169 = vector.extract_strided_slice %159 {offsets = [2, 0], sizes = [2, 32], strides = [1, 1]} : vector<4x128xf32> to vector<2x32xf32>
    %170 = vector.extract_strided_slice %160 {offsets = [2, 64], sizes = [2, 32], strides = [1, 1]} : vector<4x128xf32> to vector<2x32xf32>
    %171 = arith.mulf %169, %170 : vector<2x32xf32>
    %172 = arith.addf %168, %171 : vector<2x32xf32>
    %173 = tpu.concatenate %166, %172 in 0 : vector<2x32xf32>, vector<2x32xf32> -> vector<4x32xf32>
    %174 = math.tanh %173 : vector<4x32xf32>
    %175 = vector.extract_strided_slice %159 {offsets = [0, 96], sizes = [2, 32], strides = [1, 1]} : vector<4x128xf32> to vector<2x32xf32>
    %176 = vector.extract_strided_slice %174 {offsets = [0, 0], sizes = [2, 32], strides = [1, 1]} : vector<4x32xf32> to vector<2x32xf32>
    %177 = arith.mulf %175, %176 : vector<2x32xf32>
    %178 = vector.extract_strided_slice %159 {offsets = [2, 96], sizes = [2, 32], strides = [1, 1]} : vector<4x128xf32> to vector<2x32xf32>
    %179 = vector.extract_strided_slice %174 {offsets = [2, 0], sizes = [2, 32], strides = [1, 1]} : vector<4x32xf32> to vector<2x32xf32>
    %180 = arith.mulf %178, %179 : vector<2x32xf32>
    %181 = arith.truncf %177 : vector<2x32xf32> to vector<2x32xbf16>
    %182 = arith.truncf %180 : vector<2x32xf32> to vector<2x32xbf16>
    %183 = tpu.concatenate %181, %182 in 1 : vector<2x32xbf16>, vector<2x32xbf16> -> vector<2x64xbf16>
    %cst_29 = arith.constant dense<0.000000e+00> : vector<2x128xf32>
    %184 = tpu.matmul %181, %3, %cst_29 {dimension_numbers = #tpu.dot_dimension_numbers<[1], [0], [0], [1], [0, 0, 1, 1], [], []>} : vector<2x32xbf16>, vector<32x128xbf16>, vector<2x128xf32> -> vector<2x128xf32>
    %185 = arith.addf %30, %184 : vector<2x128xf32>
    %cst_30 = arith.constant dense<0.000000e+00> : vector<2x128xf32>
    %186 = tpu.matmul %183, %4, %cst_30 {dimension_numbers = #tpu.dot_dimension_numbers<[1], [0], [0], [1], [0, 0, 1, 1], [], []>} : vector<2x64xbf16>, vector<64x128xbf16>, vector<2x128xf32> -> vector<2x128xf32>
    %187 = arith.addf %13, %186 : vector<2x128xf32>
    %188 = tpu.concatenate %185, %187 in 0 : vector<2x128xf32>, vector<2x128xf32> -> vector<4x128xf32>
    %189 = arith.negf %188 : vector<4x128xf32>
    %190 = math.exp %189 : vector<4x128xf32>
    %cst_31 = arith.constant 1.000000e+00 : f32
    %191 = vector.broadcast %cst_31 : f32 to vector<4x128xf32>
    %192 = arith.addf %191, %190 : vector<4x128xf32>
    %193 = arith.divf %191, %192 : vector<4x128xf32>
    %194 = math.tanh %188 : vector<4x128xf32>
    %195 = vector.extract_strided_slice %193 {offsets = [0, 32], sizes = [2, 32], strides = [1, 1]} : vector<4x128xf32> to vector<2x32xf32>
    %196 = arith.mulf %195, %166 : vector<2x32xf32>
    %197 = vector.extract_strided_slice %193 {offsets = [0, 0], sizes = [2, 32], strides = [1, 1]} : vector<4x128xf32> to vector<2x32xf32>
    %198 = vector.extract_strided_slice %194 {offsets = [0, 64], sizes = [2, 32], strides = [1, 1]} : vector<4x128xf32> to vector<2x32xf32>
    %199 = arith.mulf %197, %198 : vector<2x32xf32>
    %200 = arith.addf %196, %199 : vector<2x32xf32>
    %201 = vector.extract_strided_slice %193 {offsets = [2, 32], sizes = [2, 32], strides = [1, 1]} : vector<4x128xf32> to vector<2x32xf32>
    %202 = arith.mulf %201, %172 : vector<2x32xf32>
    %203 = vector.extract_strided_slice %193 {offsets = [2, 0], sizes = [2, 32], strides = [1, 1]} : vector<4x128xf32> to vector<2x32xf32>
    %204 = vector.extract_strided_slice %194 {offsets = [2, 64], sizes = [2, 32], strides = [1, 1]} : vector<4x128xf32> to vector<2x32xf32>
    %205 = arith.mulf %203, %204 : vector<2x32xf32>
    %206 = arith.addf %202, %205 : vector<2x32xf32>
    %207 = tpu.concatenate %200, %206 in 0 : vector<2x32xf32>, vector<2x32xf32> -> vector<4x32xf32>
    %208 = math.tanh %207 : vector<4x32xf32>
    %209 = vector.extract_strided_slice %193 {offsets = [0, 96], sizes = [2, 32], strides = [1, 1]} : vector<4x128xf32> to vector<2x32xf32>
    %210 = vector.extract_strided_slice %208 {offsets = [0, 0], sizes = [2, 32], strides = [1, 1]} : vector<4x32xf32> to vector<2x32xf32>
    %211 = arith.mulf %209, %210 : vector<2x32xf32>
    %212 = vector.extract_strided_slice %193 {offsets = [2, 96], sizes = [2, 32], strides = [1, 1]} : vector<4x128xf32> to vector<2x32xf32>
    %213 = vector.extract_strided_slice %208 {offsets = [2, 0], sizes = [2, 32], strides = [1, 1]} : vector<4x32xf32> to vector<2x32xf32>
    %214 = arith.mulf %212, %213 : vector<2x32xf32>
    %215 = arith.truncf %211 : vector<2x32xf32> to vector<2x32xbf16>
    %216 = arith.truncf %214 : vector<2x32xf32> to vector<2x32xbf16>
    %217 = tpu.concatenate %215, %216 in 1 : vector<2x32xbf16>, vector<2x32xbf16> -> vector<2x64xbf16>
    %cst_32 = arith.constant dense<0.000000e+00> : vector<2x128xf32>
    %218 = tpu.matmul %215, %3, %cst_32 {dimension_numbers = #tpu.dot_dimension_numbers<[1], [0], [0], [1], [0, 0, 1, 1], [], []>} : vector<2x32xbf16>, vector<32x128xbf16>, vector<2x128xf32> -> vector<2x128xf32>
    %219 = arith.addf %30, %218 : vector<2x128xf32>
    %cst_33 = arith.constant dense<0.000000e+00> : vector<2x128xf32>
    %220 = tpu.matmul %217, %4, %cst_33 {dimension_numbers = #tpu.dot_dimension_numbers<[1], [0], [0], [1], [0, 0, 1, 1], [], []>} : vector<2x64xbf16>, vector<64x128xbf16>, vector<2x128xf32> -> vector<2x128xf32>
    %221 = arith.addf %13, %220 : vector<2x128xf32>
    %222 = tpu.concatenate %219, %221 in 0 : vector<2x128xf32>, vector<2x128xf32> -> vector<4x128xf32>
    %223 = arith.negf %222 : vector<4x128xf32>
    %224 = math.exp %223 : vector<4x128xf32>
    %cst_34 = arith.constant 1.000000e+00 : f32
    %225 = vector.broadcast %cst_34 : f32 to vector<4x128xf32>
    %226 = arith.addf %225, %224 : vector<4x128xf32>
    %227 = arith.divf %225, %226 : vector<4x128xf32>
    %228 = math.tanh %222 : vector<4x128xf32>
    %229 = vector.extract_strided_slice %227 {offsets = [0, 32], sizes = [2, 32], strides = [1, 1]} : vector<4x128xf32> to vector<2x32xf32>
    %230 = arith.mulf %229, %200 : vector<2x32xf32>
    %231 = vector.extract_strided_slice %227 {offsets = [0, 0], sizes = [2, 32], strides = [1, 1]} : vector<4x128xf32> to vector<2x32xf32>
    %232 = vector.extract_strided_slice %228 {offsets = [0, 64], sizes = [2, 32], strides = [1, 1]} : vector<4x128xf32> to vector<2x32xf32>
    %233 = arith.mulf %231, %232 : vector<2x32xf32>
    %234 = arith.addf %230, %233 : vector<2x32xf32>
    %235 = vector.extract_strided_slice %227 {offsets = [2, 32], sizes = [2, 32], strides = [1, 1]} : vector<4x128xf32> to vector<2x32xf32>
    %236 = arith.mulf %235, %206 : vector<2x32xf32>
    %237 = vector.extract_strided_slice %227 {offsets = [2, 0], sizes = [2, 32], strides = [1, 1]} : vector<4x128xf32> to vector<2x32xf32>
    %238 = vector.extract_strided_slice %228 {offsets = [2, 64], sizes = [2, 32], strides = [1, 1]} : vector<4x128xf32> to vector<2x32xf32>
    %239 = arith.mulf %237, %238 : vector<2x32xf32>
    %240 = arith.addf %236, %239 : vector<2x32xf32>
    %241 = tpu.concatenate %234, %240 in 0 : vector<2x32xf32>, vector<2x32xf32> -> vector<4x32xf32>
    %242 = math.tanh %241 : vector<4x32xf32>
    %243 = vector.extract_strided_slice %227 {offsets = [0, 96], sizes = [2, 32], strides = [1, 1]} : vector<4x128xf32> to vector<2x32xf32>
    %244 = vector.extract_strided_slice %242 {offsets = [0, 0], sizes = [2, 32], strides = [1, 1]} : vector<4x32xf32> to vector<2x32xf32>
    %245 = arith.mulf %243, %244 : vector<2x32xf32>
    %246 = vector.extract_strided_slice %227 {offsets = [2, 96], sizes = [2, 32], strides = [1, 1]} : vector<4x128xf32> to vector<2x32xf32>
    %247 = vector.extract_strided_slice %242 {offsets = [2, 0], sizes = [2, 32], strides = [1, 1]} : vector<4x32xf32> to vector<2x32xf32>
    %248 = arith.mulf %246, %247 : vector<2x32xf32>
    %249 = arith.truncf %245 : vector<2x32xf32> to vector<2x32xbf16>
    %250 = arith.truncf %248 : vector<2x32xf32> to vector<2x32xbf16>
    %251 = tpu.concatenate %249, %250 in 1 : vector<2x32xbf16>, vector<2x32xbf16> -> vector<2x64xbf16>
    %cst_35 = arith.constant dense<0.000000e+00> : vector<2x128xf32>
    %252 = tpu.matmul %249, %3, %cst_35 {dimension_numbers = #tpu.dot_dimension_numbers<[1], [0], [0], [1], [0, 0, 1, 1], [], []>} : vector<2x32xbf16>, vector<32x128xbf16>, vector<2x128xf32> -> vector<2x128xf32>
    %253 = arith.addf %30, %252 : vector<2x128xf32>
    %cst_36 = arith.constant dense<0.000000e+00> : vector<2x128xf32>
    %254 = tpu.matmul %251, %4, %cst_36 {dimension_numbers = #tpu.dot_dimension_numbers<[1], [0], [0], [1], [0, 0, 1, 1], [], []>} : vector<2x64xbf16>, vector<64x128xbf16>, vector<2x128xf32> -> vector<2x128xf32>
    %255 = arith.addf %13, %254 : vector<2x128xf32>
    %256 = tpu.concatenate %253, %255 in 0 : vector<2x128xf32>, vector<2x128xf32> -> vector<4x128xf32>
    %257 = arith.negf %256 : vector<4x128xf32>
    %258 = math.exp %257 : vector<4x128xf32>
    %cst_37 = arith.constant 1.000000e+00 : f32
    %259 = vector.broadcast %cst_37 : f32 to vector<4x128xf32>
    %260 = arith.addf %259, %258 : vector<4x128xf32>
    %261 = arith.divf %259, %260 : vector<4x128xf32>
    %262 = math.tanh %256 : vector<4x128xf32>
    %263 = vector.extract_strided_slice %261 {offsets = [0, 32], sizes = [2, 32], strides = [1, 1]} : vector<4x128xf32> to vector<2x32xf32>
    %264 = arith.mulf %263, %234 : vector<2x32xf32>
    %265 = vector.extract_strided_slice %261 {offsets = [0, 0], sizes = [2, 32], strides = [1, 1]} : vector<4x128xf32> to vector<2x32xf32>
    %266 = vector.extract_strided_slice %262 {offsets = [0, 64], sizes = [2, 32], strides = [1, 1]} : vector<4x128xf32> to vector<2x32xf32>
    %267 = arith.mulf %265, %266 : vector<2x32xf32>
    %268 = arith.addf %264, %267 : vector<2x32xf32>
    %269 = vector.extract_strided_slice %261 {offsets = [2, 32], sizes = [2, 32], strides = [1, 1]} : vector<4x128xf32> to vector<2x32xf32>
    %270 = arith.mulf %269, %240 : vector<2x32xf32>
    %271 = vector.extract_strided_slice %261 {offsets = [2, 0], sizes = [2, 32], strides = [1, 1]} : vector<4x128xf32> to vector<2x32xf32>
    %272 = vector.extract_strided_slice %262 {offsets = [2, 64], sizes = [2, 32], strides = [1, 1]} : vector<4x128xf32> to vector<2x32xf32>
    %273 = arith.mulf %271, %272 : vector<2x32xf32>
    %274 = arith.addf %270, %273 : vector<2x32xf32>
    %275 = tpu.concatenate %268, %274 in 0 : vector<2x32xf32>, vector<2x32xf32> -> vector<4x32xf32>
    %276 = math.tanh %275 : vector<4x32xf32>
    %277 = vector.extract_strided_slice %261 {offsets = [0, 96], sizes = [2, 32], strides = [1, 1]} : vector<4x128xf32> to vector<2x32xf32>
    %278 = vector.extract_strided_slice %276 {offsets = [0, 0], sizes = [2, 32], strides = [1, 1]} : vector<4x32xf32> to vector<2x32xf32>
    %279 = arith.mulf %277, %278 : vector<2x32xf32>
    %280 = vector.extract_strided_slice %261 {offsets = [2, 96], sizes = [2, 32], strides = [1, 1]} : vector<4x128xf32> to vector<2x32xf32>
    %281 = vector.extract_strided_slice %276 {offsets = [2, 0], sizes = [2, 32], strides = [1, 1]} : vector<4x32xf32> to vector<2x32xf32>
    %282 = arith.mulf %280, %281 : vector<2x32xf32>
    %283 = arith.truncf %279 : vector<2x32xf32> to vector<2x32xbf16>
    %284 = arith.truncf %282 : vector<2x32xf32> to vector<2x32xbf16>
    %285 = tpu.concatenate %283, %284 in 1 : vector<2x32xbf16>, vector<2x32xbf16> -> vector<2x64xbf16>
    %cst_38 = arith.constant dense<0.000000e+00> : vector<2x128xf32>
    %286 = tpu.matmul %285, %4, %cst_38 {dimension_numbers = #tpu.dot_dimension_numbers<[1], [0], [0], [1], [0, 0, 1, 1], [], []>} : vector<2x64xbf16>, vector<64x128xbf16>, vector<2x128xf32> -> vector<2x128xf32>
    %287 = arith.addf %13, %286 : vector<2x128xf32>
    %288 = arith.negf %287 : vector<2x128xf32>
    %289 = math.exp %288 : vector<2x128xf32>
    %cst_39 = arith.constant 1.000000e+00 : f32
    %290 = vector.broadcast %cst_39 : f32 to vector<2x128xf32>
    %291 = arith.addf %290, %289 : vector<2x128xf32>
    %292 = arith.divf %290, %291 : vector<2x128xf32>
    %293 = math.tanh %287 : vector<2x128xf32>
    %294 = vector.extract_strided_slice %292 {offsets = [0, 32], sizes = [2, 32], strides = [1, 1]} : vector<2x128xf32> to vector<2x32xf32>
    %295 = arith.mulf %294, %274 : vector<2x32xf32>
    %296 = vector.extract_strided_slice %292 {offsets = [0, 0], sizes = [2, 32], strides = [1, 1]} : vector<2x128xf32> to vector<2x32xf32>
    %297 = vector.extract_strided_slice %293 {offsets = [0, 64], sizes = [2, 32], strides = [1, 1]} : vector<2x128xf32> to vector<2x32xf32>
    %298 = arith.mulf %296, %297 : vector<2x32xf32>
    %299 = arith.addf %295, %298 : vector<2x32xf32>
    %300 = vector.extract_strided_slice %292 {offsets = [0, 96], sizes = [2, 32], strides = [1, 1]} : vector<2x128xf32> to vector<2x32xf32>
    %301 = math.tanh %299 : vector<2x32xf32>
    %302 = arith.mulf %300, %301 : vector<2x32xf32>
    %303 = tpu.concatenate %78, %112, %146, %180, %214, %248, %282, %302 in 1 : vector<2x32xf32>, vector<2x32xf32>, vector<2x32xf32>, vector<2x32xf32>, vector<2x32xf32>, vector<2x32xf32>, vector<2x32xf32>, vector<2x32xf32> -> vector<2x256xf32>
    %304 = arith.truncf %303 : vector<2x256xf32> to vector<2x256xbf16>
    %cst_40 = arith.constant dense<0.000000e+00> : vector<2x128xf32>
    %305 = tpu.matmul %304, %5, %cst_40 {dimension_numbers = #tpu.dot_dimension_numbers<[1], [0], [0], [1], [0, 0, 1, 1], [], []>} : vector<2x256xbf16>, vector<256x128xbf16>, vector<2x128xf32> -> vector<2x128xf32>
    %306 = vector.broadcast %10 : vector<1x128xf32> to vector<2x128xf32>
    %307 = arith.addf %305, %306 : vector<2x128xf32>
    %c0_41 = arith.constant 0 : index
    %c0_42 = arith.constant 0 : index
    %308 = vector.load %arg4[%c0_41, %c0_42] : memref<2x128xf32, #tpu.memory_space<vmem>>, vector<2x128xf32>
    tpu.vector_store %arg4[%c0_41, %c0_42], %307 {strides = array<i32>} : memref<2x128xf32, #tpu.memory_space<vmem>>, vector<2x128xf32>,
    return
  }
  func.func @transform_0(%arg0: i32) -> (i32, i32) {
    %c0_i32 = arith.constant 0 : i32
    %c0_i32_0 = arith.constant 0 : i32
    return %arg0, %c0_i32 : i32, i32
  }
  func.func @transform_1(%arg0: i32) -> (i32, i32) {
    %c0_i32 = arith.constant 0 : i32
    %c0_i32_0 = arith.constant 0 : i32
    %c0_i32_1 = arith.constant 0 : i32
    return %c0_i32, %c0_i32_0 : i32, i32
  }
  func.func @transform_2(%arg0: i32) -> (i32, i32) {
    %c0_i32 = arith.constant 0 : i32
    %c0_i32_0 = arith.constant 0 : i32
    %c0_i32_1 = arith.constant 0 : i32
    return %c0_i32, %c0_i32_0 : i32, i32
  }
  func.func @transform_3(%arg0: i32) -> (i32, i32) {
    %c0_i32 = arith.constant 0 : i32
    %c0_i32_0 = arith.constant 0 : i32
    return %arg0, %c0_i32 : i32, i32
  }
}

</mosaic_0001>

<bundles_post_ra>
// kernel: decoder_forward.1
= control target key start
LH: loop header
LB: loop body
LE: loop exit
PB: predicated region body
PF: predicated region fallthrough
CT: control target
= control target key end

     0   :  { %8 = vsyncpa [#allocation3], 0  ;;  %s2557_s0 = inlined_call_operand.hbm [shape: f32[2,32], index: 0, kind: input, shape index: {}]   ;;  %s2558_s1 = inlined_call_operand.hbm [shape: bf16[640,128], index: 1, kind: input, shape index: {}]   ;;  %s2559_s2 = inlined_call_operand.hbm [shape: f32[5,128], index: 2, kind: input, shape index: {}]   ;;  %s2560_s3 = inlined_call_operand.vmem [shape: f32[2,128], index: 3, kind: output, shape index: {}]  }
   0x1   :  { %9 = vsyncpa [#allocation5], 0  ;;  %s2178_s12 = smov [#allocation4]   ;;  %s2108_s16 = scalar_lea.hbm %s2558_s1, 5120 }
   0x2   :  { %s25_s13 = sshll.u32 %s2178_s12, 4  ;;  %p2109_p0 = scmp.ne.s32.totalorder %s2558_s1, %s2108_s16  ;;  %s26_s13 = int_to_ptr.vmem [resolvable:$true] %s25_s13 }
   0x3   :  { %p2112_p1 = scmp.lt.u32.totalorder %s2108_s16, %s2558_s1 }
   0x5   :  { %p2114_p2 = pnand %p2112_p1, %p2109_p0 }
   0x7   :  { %2117 = shalt.err (!%p2114_p2)
}
   0x8   :  { %s2118_s21 = scalar_lea.vmem %s26_s13, 5120  ;;  %p2123_p4 = scmp.lt.s32.totalorder %s26_s13, %s26_s13 }
   0x9   :  { %p2119_p3 = scmp.ne.s32.totalorder %s26_s13, %s2118_s21  ;;  %p2124_p5 = scmp.lt.s32.totalorder %s2118_s21, %s2118_s21 }
   0xb   :  { %p2125_p6 = por %p2124_p5, %p2123_p4 }
   0xd   :  { %p2126_p7 = pnand %p2125_p6, %p2119_p3 }
   0xf   :  { %2129 = shalt.err (!%p2126_p7)
}
  0x10   :  { %s2179_s22 = smov 64   ;;  %s2180_s23 = smov 4  }
  0x11   :  { %31 = dma.hbm_to_vmem [thread:$0]  %s2558_s1, 5120, %s26_s13, [#allocation5], %s2179_s22, %s2179_s22, %s2180_s23  }
  0x12   :  { %s2181_s26 = smov [#allocation2]   ;;  %s2182_s28 = smov [#allocation6]  }
  0x13   :  { %s16_s27 = sshll.u32 %s2181_s26, 4  ;;  %s38_s29 = sshll.u32 %s2182_s28, 4  ;;  %s17_s27 = int_to_ptr.vmem [resolvable:$true] %s16_s27  ;;  %s39_s29 = int_to_ptr.vmem [resolvable:$true] %s38_s29 }
  0x14   :  { %s2130_s5 = scalar_lea.hbm %s2557_s0, 32 }
  0x15   :  { %p2131_p8 = scmp.ne.s32.totalorder %s2557_s0, %s2130_s5  ;;  %p2134_p9 = scmp.lt.u32.totalorder %s2130_s5, %s2557_s0 }
  0x17   :  { %p2136_p10 = pnand %p2134_p9, %p2131_p8 }
  0x19   :  { %2139 = shalt.err (!%p2136_p10)
}
  0x1a   :  { %s2140_s1 = scalar_lea.vmem %s17_s27, 32  ;;  %p2145_p12 = scmp.lt.s32.totalorder %s17_s27, %s17_s27 }
  0x1b   :  { %p2141_p11 = scmp.ne.s32.totalorder %s17_s27, %s2140_s1  ;;  %p2146_p13 = scmp.lt.s32.totalorder %s2140_s1, %s2140_s1 }
  0x1d   :  { %p2147_p0 = por %p2146_p13, %p2145_p12 }
  0x1f   :  { %p2148_p1 = pnand %p2147_p0, %p2141_p11 }
  0x21   :  { %2151 = shalt.err (!%p2148_p1)
}
  0x22   :  { %19 = dma.hbm_to_vmem [thread:$0]  %s2557_s0, 32, %s17_s27, [#allocation3]  }
  0x23   :  { %s2152_s14 = scalar_lea.hbm %s2559_s2, 128 }
  0x24   :  { %p2153_p2 = scmp.ne.s32.totalorder %s2559_s2, %s2152_s14  ;;  %p2156_p3 = scmp.lt.u32.totalorder %s2152_s14, %s2559_s2 }
  0x26   :  { %p2158_p4 = pnand %p2156_p3, %p2153_p2 }
  0x28   :  { %2161 = shalt.err (!%p2158_p4)
}
  0x29   :  { %s2162_s19 = scalar_lea.vmem %s39_s29, 128  ;;  %p2167_p6 = scmp.lt.s32.totalorder %s39_s29, %s39_s29 }
  0x2a   :  { %p2163_p5 = scmp.ne.s32.totalorder %s39_s29, %s2162_s19  ;;  %p2168_p7 = scmp.lt.s32.totalorder %s2162_s19, %s2162_s19 }
  0x2c   :  { %p2169_p8 = por %p2168_p7, %p2167_p6 }
  0x2e   :  { %p2170_p9 = pnand %p2169_p8, %p2163_p5 }
  0x30   :  { %2173 = shalt.err (!%p2170_p9)
}
  0x31   :  { %41 = dma.hbm_to_vmem [thread:$0]  %s2559_s2, 128, %s39_s29, [#allocation5]  }
  0x32   :  { %2174 = dma.done.wait [#allocation3], 32  }
  0x33   :  { %2175 = vsyncadd [#allocation3], 4294967264 }
  0x34   :  { %2176 = dma.done.wait [#allocation5], 5248  }
  0x35   :  { %2177 = vsyncadd [#allocation5], 4294962048  ;;  %v2183_v0 = vmov 0.0   ;;  %vm2184_vm0 = vmmov 0   ;;  %v1995_v1 = vld [vmem:[#allocation4] sm:$0xff]   ;;  %v1996_v2 = vld [vmem:[#allocation4 + $0x8] sm:$0xff]   ;;  %v133_v19 = vlaneseq }
  0x36   :  { %1771 = vmatprep.subr.bf16.mxu0 %v2183_v0  ;;  %1775 = vmatprep.mubr.msk.bf16.mxu0 %vm2184_vm0, %v2183_v0  ;;  %v137_v3 = vld [vmem:[#allocation2] sm:$0x3]  ;;  %v1997_v4 = vld [vmem:[#allocation4 + $0x10] sm:$0xff]   ;;  %vm155_vm1 = vcmask 261120   ;;  %v1999_v7 = vld [vmem:[#allocation4 + $0x20] sm:$0xff]   ;;  %s2185_s2 = smov 96  }
  0x37   :  { %1779 = vmatprep.subr.bf16.mxu1 %v2183_v0  ;;  %1795 = vmatprep.mubr.msk.bf16.mxu1 %vm2184_vm0, %v2183_v0  ;;  %v138_v5 = vpack.c.bf16 %v137_v3, %v137_v3  ;;  %v1998_v6 = vld [vmem:[#allocation4 + $0x18] sm:$0xff]   ;;  %v2000_v8 = vld [vmem:[#allocation4 + $0x28] sm:$0xff]   ;;  %v2001_v9 = vld [vmem:[#allocation4 + $0x30] sm:$0xff]   ;;  %v2270_v20 = vshrl.u32 %v133_v19, 7  ;;  %s2186_s21 = smov 32   ;;  %vm491_vm2 = vcmask 523264  }
  0x38   :  { %1772 = vmatpush3.bf16.msra.mxu0 %v1995_v1  ;;  %1780 = vmatpush3.bf16.msra.mxu1 %v1997_v4  ;;  %v2002_v10 = vld [vmem:[#allocation4 + $0x38] sm:$0xff]   ;;  %v2003_v11 = vld [vmem:[#allocation4 + $0x40] sm:$0xff]   ;;  %v2004_v12 = vld [vmem:[#allocation4 + $0x48] sm:$0xff]   ;;  %vm538_vm3 = vcmask 1041408   ;;  %vm1442_vm4 = vcmask 785408  }
  0x39   :  { %1773 = vmatprep.subr.bf16.mxu0 %v2183_v0  ;;  %1781 = vmatprep.subr.bf16.mxu1 %v2183_v0  ;;  %v2005_v13 = vld [vmem:[#allocation4 + $0x50] sm:$0xff]   ;;  %v2006_v14 = vld [vmem:[#allocation4 + $0x58] sm:$0xff]   ;;  %v2007_v15 = vld [vmem:[#allocation4 + $0x60] sm:$0xff]   ;;  %v141_v21 = vsub.s32 0, %v2270_v20  ;;  %v203_v33 = vsub.s32 1, %v2270_v20  ;;  %v297_v42 = vsub.s32 2, %v2270_v20 }
  0x3a   :  { %v2008_v16 = vld [vmem:[#allocation4 + $0x68] sm:$0xff]   ;;  %v2009_v17 = vld [vmem:[#allocation4 + $0x70] sm:$0xff]   ;;  %v2010_v18 = vld [vmem:[#allocation4 + $0x78] sm:$0xff]  }
  0x3b   :  { %v2273_v22 = vld [vmem:[#allocation6] sm:$0x1f]  ;;  %v2012_v32 = vld [vmem:[#allocation4 + $0x88] sm:$0xff]   ;;  %v2291_v56 = vld [vmem:[#allocation4 + $0x90] sm:$0xff]  }
  0x3c   :  { %1774 = vmatpush3.bf16.msra.mxu0 %v1996_v2  ;;  %1782 = vmatpush3.bf16.msra.mxu1 %v1998_v6  ;;  %v142_v23 = vrot.slane %v2273_v22, %v141_v21  ;;  %v2011_v31 = vld [vmem:[#allocation4 + $0x80] sm:$0xff]   ;;  %v204_v34 = vrot.slane %v2273_v22, %v203_v33  ;;  %v298_v43 = vrot.slane %v2273_v22, %v297_v42  ;;  %v2294_v57 = vld [vmem:[#allocation4 + $0x98] sm:$0xff]   ;;  %v2310_v1 = vld [vmem:[#allocation4 + $0xa8] sm:$0xff]  }
  0x3d   :  { %1799 = vmatprep.subr.bf16.mxu0 %v2183_v0  ;;  %1783 = vmatprep.subr.bf16.mxu1 %v2183_v0  ;;  %v2306_v62 = vld [vmem:[#allocation4 + $0xa0] sm:$0xff]   ;;  %v2316_v2 = vld [vmem:[#allocation4 + $0xb0] sm:$0xff]   ;;  %v2320_v3 = vld [vmem:[#allocation4 + $0xb8] sm:$0xff]  }
  0x3f   :  { %1776 = vmatmul.mubr.msk.bf16.vlgmr.msra.gmra.mrb[0].mxu0 %vm155_vm1, %v138_v5 }
  0x40   :  { %1815 = vmatprep.mubr.msk.bf16.mxu0 %vm2184_vm0, %v2183_v0  ;;  %1784 = vmatpush3.bf16.msra.mxu1 %v1999_v7 }
  0x41   :  { %1785 = vmatprep.subr.bf16.mxu1 %v2183_v0  ;;  %1800 = vmatpush3.bf16.msra.mxu0 %v2005_v13 }
  0x42   :  { %1801 = vmatprep.subr.bf16.mxu0 %v2183_v0 }
  0x44   :  { %1786 = vmatpush3.bf16.msra.mxu1 %v2000_v8 }
  0x45   :  { %1787 = vmatprep.subr.bf16.mxu1 %v2183_v0  ;;  %1802 = vmatpush3.bf16.msra.mxu0 %v2006_v14 }
  0x46   :  { %1803 = vmatprep.subr.bf16.mxu0 %v2183_v0 }
  0x48   :  { %1788 = vmatpush3.bf16.msra.mxu1 %v2001_v9  ;;  %v135_v9 = vsub.s32 3, %v2270_v20 }
  0x49   :  { %1789 = vmatprep.subr.bf16.mxu1 %v2183_v0  ;;  %1804 = vmatpush3.bf16.msra.mxu0 %v2007_v15 }
  0x4a   :  { %1805 = vmatprep.subr.bf16.mxu0 %v2183_v0 }
  0x4c   :  { %1790 = vmatpush3.bf16.msra.mxu1 %v2002_v10  ;;  %v2335_v10 = vrot.slane %v2273_v22, %v135_v9 }
  0x4d   :  { %1791 = vmatprep.subr.bf16.mxu1 %v2183_v0  ;;  %1806 = vmatpush3.bf16.msra.mxu0 %v2008_v16 }
  0x4e   :  { %1807 = vmatprep.subr.bf16.mxu0 %v2183_v0 }
  0x50   :  { %1792 = vmatpush3.bf16.msra.mxu1 %v2003_v11 }
  0x51   :  { %1793 = vmatprep.subr.bf16.mxu1 %v2183_v0  ;;  %1808 = vmatpush3.bf16.msra.mxu0 %v2009_v17 }
  0x52   :  { %1809 = vmatprep.subr.bf16.mxu0 %v2183_v0 }
  0x54   :  { %1794 = vmatpush3.bf16.msra.mxu1 %v2004_v12 }
  0x55   :  { %1819 = vmatprep.subr.bf16.mxu1 %v2183_v0  ;;  %1810 = vmatpush3.bf16.msra.mxu0 %v2010_v18 }
  0x56   :  { %1811 = vmatprep.subr.bf16.mxu0 %v2183_v0 }
  0x59   :  { %1812 = vmatpush3.bf16.msra.mxu0 %v2011_v31 }
  0x5a   :  { %1813 = vmatprep.subr.bf16.mxu0 %v2183_v0 }
  0x5d   :  { %1814 = vmatpush3.bf16.msra.mxu0 %v2012_v32 }
  0x5e   :  { %1859 = vmatprep.subr.bf16.mxu0 %v2183_v0 }
 0x112   :  { %v193_v24 = vpop.f32.mrb[0].mxu0 }
 0x113   :  { %v194_v25 = vadd.f32 %v193_v24, %v142_v23  ;;  %v1777_v26 = vpop.f32.mrb[1].mxu0 }
 0x114   :  { %v196_v27 = vpop.f32.mrb[2].mxu0 }
 0x115   :  { %v199_v28 = vmax.f32 %v194_v25, 0.0  ;;  %v1778_v29 = vpop.f32.mrb[3].mxu0 }
 0x117   :  { %v200_v30 = vpack.c.bf16 %v199_v28, %v199_v28 }
 0x119   :  { %1796 = vmatmul.mubr.bf16.vlgmr.msra.gmra.mrb[0].mxu1 %v200_v30 }
 0x11a   :  { %1823 = vmatprep.mubr.msk.bf16.mxu1 %vm2184_vm0, %v2183_v0  ;;  %1820 = vmatpush3.bf16.msra.mxu1 %v2291_v56 }
 0x11b   :  { %1821 = vmatprep.subr.bf16.mxu1 %v2183_v0 }
 0x11e   :  { %1822 = vmatpush3.bf16.msra.mxu1 %v2294_v57 }
 0x11f   :  { %1827 = vmatprep.subr.bf16.mxu1 %v2183_v0 }
 0x1ec   :  { %v287_v35 = vpop.f32.mrb[0].mxu1 }
 0x1ed   :  { %v288_v36 = vadd.f32 %v287_v35, %v204_v34  ;;  %v1797_v37 = vpop.f32.mrb[1].mxu1 }
 0x1ee   :  { %v290_v38 = vpop.f32.mrb[2].mxu1 }
 0x1ef   :  { %v293_v39 = vmax.f32 %v288_v36, 0.0  ;;  %v1798_v40 = vpop.f32.mrb[3].mxu1 }
 0x1f1   :  { %v294_v41 = vpack.c.bf16 %v293_v39, %v293_v39 }
 0x1f3   :  { %1816 = vmatmul.mubr.bf16.vlgmr.msra.gmra.mrb[4].mxu0 %v294_v41 }
 0x1f4   :  { %1863 = vmatprep.mubr.msk.bf16.mxu0 %vm2184_vm0, %v2183_v0  ;;  %1860 = vmatpush3.bf16.msra.mxu0 %v2291_v56 }
 0x1f5   :  { %1861 = vmatprep.subr.bf16.mxu0 %v2183_v0 }
 0x1f8   :  { %1862 = vmatpush3.bf16.msra.mxu0 %v2294_v57 }
 0x1f9   :  { %1867 = vmatprep.subr.bf16.mxu0 %v2183_v0 }
 0x2c6   :  { %v381_v44 = vpop.f32.mrb[4].mxu0 }
 0x2c7   :  { %v2286_v45 = vadd.f32 %v381_v44, %v298_v43  ;;  %v1817_v46 = vpop.f32.mrb[5].mxu0 }
 0x2c8   :  { %v384_v47 = vpop.f32.mrb[6].mxu0 }
 0x2c9   :  { %v1818_v48 = vpop.f32.mrb[7].mxu0  ;;  %2035 = vtanh.f32 %v2286_v45  ;;  %v1621_v50 = vmul.f32 -1.442695, %v2286_v45 }
 0x2cb   :  { %2037 = vpow2.f32 %v1621_v50 }
 0x2d3   :  { %v2036_v49 = vpop.eup %2035 }
 0x2d4   :  { %395 = vrot.lane.b32.xlu0 %v2036_v49, %s2179_s22 }
 0x2d5   :  { %v2038_v51 = vpop.eup %2037 }
 0x2d6   :  { %v390_v52 = vadd.f32 1.0, %v2038_v51 }
 0x2d8   :  { %2039 = vrcp.f32 %v390_v52 }
 0x2e2   :  { %v2040_v53 = vpop.eup %2039 }
 0x346   :  { %v396_v54 = vpop.permute.xlu0 %395 }
 0x347   :  { %v398_v55 = vmul.f32 %v2040_v53, %v396_v54 }
 0x349   :  { %2041 = vtanh.f32 %v398_v55 }
 0x353   :  { %v2042_v58 = vpop.eup %2041 }
 0x354   :  { %401 = vrot.lane.b32.xlu0 %v2042_v58, %s2185_s2 }
 0x358   :  { %548 = vrot.lane.b32.xlu0 %v398_v55, %s2186_s21 }
 0x3c6   :  { %v402_v59 = vpop.permute.xlu0 %401 }
 0x3c7   :  { %v404_v60 = vmul.f32 %v2040_v53, %v402_v59 }
 0x3c9   :  { %v405_v61 = vpack.c.bf16 %v404_v60, %v404_v60 }
 0x3ca   :  { %v549_v27 = vpop.permute.xlu0 %548 }
 0x3cb   :  { %407 = vrot.lane.b32.xlu1 %v405_v61, %s2186_s21 }
 0x43d   :  { %v408_v63 = vpop.permute.xlu1 %407 }
 0x43e   :  { %1824 = vmatmul.mubr.msk.bf16.vlgmr.msra.gmra.mrb[4].mxu1 %vm155_vm1, %v408_v63  ;;  %v411_v4 = vsel %vm155_vm1, %v408_v63, 0 }
 0x43f   :  { %1828 = vmatpush3.bf16.msra.mxu1 %v2306_v62  ;;  %1835 = vmatprep.mubr.msk.bf16.mxu1 %vm2184_vm0, %v2183_v0 }
 0x440   :  { %1829 = vmatprep.subr.bf16.mxu1 %v2183_v0 }
 0x443   :  { %1830 = vmatpush3.bf16.msra.mxu1 %v2310_v1 }
 0x444   :  { %1831 = vmatprep.subr.bf16.mxu1 %v2183_v0 }
 0x447   :  { %1832 = vmatpush3.bf16.msra.mxu1 %v2316_v2 }
 0x448   :  { %1833 = vmatprep.subr.bf16.mxu1 %v2183_v0 }
 0x44b   :  { %1834 = vmatpush3.bf16.msra.mxu1 %v2320_v3 }
 0x44c   :  { %1839 = vmatprep.subr.bf16.mxu1 %v2183_v0 }
 0x44e   :  { %1836 = vmatmul.mubr.msk.bf16.vlgmr.msra.gmra.mrb[8].mxu1 %vm491_vm2, %v411_v4 }
 0x44f   :  { %1840 = vmatpush3.bf16.msra.mxu1 %v2291_v56  ;;  %1843 = vmatprep.mubr.msk.bf16.mxu1 %vm2184_vm0, %v2183_v0 }
 0x450   :  { %1841 = vmatprep.subr.bf16.mxu1 %v2183_v0 }
 0x453   :  { %1842 = vmatpush3.bf16.msra.mxu1 %v2294_v57 }
 0x454   :  { %1847 = vmatprep.subr.bf16.mxu1 %v2183_v0 }
 0x511   :  { %v460_v5 = vpop.f32.mrb[4].mxu1 }
 0x512   :  { %v1825_v6 = vpop.f32.mrb[5].mxu1  ;;  %v466_v15 = vadd.f32 %v460_v5, %v2286_v45 }
 0x513   :  { %v463_v7 = vpop.f32.mrb[6].mxu1 }
 0x514   :  { %v1826_v8 = vpop.f32.mrb[7].mxu1 }
 0x521   :  { %v528_v11 = vpop.f32.mrb[8].mxu1 }
 0x522   :  { %v534_v12 = vadd.f32 %v528_v11, %v2335_v10  ;;  %v1837_v13 = vpop.f32.mrb[9].mxu1 }
 0x523   :  { %v531_v14 = vpop.f32.mrb[10].mxu1 }
 0x524   :  { %v536_v16 = vrot.slane %v534_v12, 6  ;;  %v1838_v17 = vpop.f32.mrb[11].mxu1 }
 0x526   :  { %v539_v18 = vsel %vm538_vm3, %v466_v15, %v536_v16 }
 0x527   :  { %2043 = vtanh.f32 %v539_v18  ;;  %v1630_v21 = vmul.f32 -1.442695, %v539_v18 }
 0x529   :  { %2045 = vpow2.f32 %v1630_v21 }
 0x531   :  { %v2044_v19 = vpop.eup %2043 }
 0x532   :  { %553 = vrot.lane.b32.xlu1 %v2044_v19, %s2179_s22 }
 0x533   :  { %v2046_v22 = vpop.eup %2045 }
 0x534   :  { %v543_v23 = vadd.f32 1.0, %v2046_v22 }
 0x536   :  { %2047 = vrcp.f32 %v543_v23 }
 0x540   :  { %v2048_v24 = vpop.eup %2047 }
 0x541   :  { %v562_v28 = vmul.f32 0.0, %v2048_v24  ;;  %v551_v29 = vmul.f32 %v2048_v24, %v549_v27 }
 0x5a4   :  { %v554_v25 = vpop.permute.xlu1 %553 }
 0x5a5   :  { %v556_v26 = vmul.f32 %v2048_v24, %v554_v25 }
 0x5a7   :  { %558 = vrot.lane.b32.xlu1 %v556_v26, %s2186_s21 }
 0x619   :  { %v559_v30 = vpop.permute.xlu1 %558 }
 0x61a   :  { %v561_v31 = vadd.f32 %v559_v30, %v551_v29  ;;  %v563_v32 = vadd.f32 %v562_v28, %v559_v30 }
 0x61c   :  { %v564_v33 = vsel %vm538_vm3, %v561_v31, %v563_v32 }
 0x61d   :  { %2049 = vtanh.f32 %v564_v33 }
 0x627   :  { %v2050_v34 = vpop.eup %2049 }
 0x628   :  { %567 = vrot.lane.b32.xlu0 %v2050_v34, %s2179_s22 }
 0x69a   :  { %v568_v35 = vpop.permute.xlu0 %567 }
 0x69b   :  { %v2344_v36 = vmul.f32 %v2048_v24, %v568_v35 }
 0x69d   :  { %v571_v37 = vpack.c.bf16 %v2344_v36, %v2344_v36 }
 0x69f   :  { %573 = vrot.lane.b32.xlu1 %v571_v37, %s2186_s21  ;;  %v575_v38 = vrot.slane %v571_v37, 1 }
 0x6a1   :  { %576 = vrot.lane.b32.xlu0 %v575_v38, %s2179_s22 }
 0x711   :  { %v574_v39 = vpop.permute.xlu1 %573 }
 0x712   :  { %1844 = vmatmul.mubr.msk.bf16.vlgmr.msra.gmra.mrb[12].mxu1 %vm155_vm1, %v574_v39 }
 0x713   :  { %1848 = vmatpush3.bf16.msra.mxu1 %v2306_v62  ;;  %1855 = vmatprep.mubr.msk.bf16.mxu1 %vm2184_vm0, %v2183_v0  ;;  %v577_v40 = vpop.permute.xlu0 %576 }
 0x714   :  { %1849 = vmatprep.subr.bf16.mxu1 %v2183_v0  ;;  %v580_v41 = vsel %vm155_vm1, %v574_v39, %v577_v40 }
 0x717   :  { %1850 = vmatpush3.bf16.msra.mxu1 %v2310_v1 }
 0x718   :  { %1851 = vmatprep.subr.bf16.mxu1 %v2183_v0 }
 0x71b   :  { %1852 = vmatpush3.bf16.msra.mxu1 %v2316_v2 }
 0x71c   :  { %1853 = vmatprep.subr.bf16.mxu1 %v2183_v0 }
 0x71f   :  { %1854 = vmatpush3.bf16.msra.mxu1 %v2320_v3 }
 0x720   :  { %1879 = vmatprep.subr.bf16.mxu1 %v2183_v0 }
 0x722   :  { %1856 = vmatmul.mubr.msk.bf16.vlgmr.msra.gmra.mrb[16].mxu1 %vm491_vm2, %v580_v41 }
 0x723   :  { %1880 = vmatpush3.bf16.msra.mxu1 %v2291_v56  ;;  %1883 = vmatprep.mubr.msk.bf16.mxu1 %vm2184_vm0, %v2183_v0 }
 0x724   :  { %1881 = vmatprep.subr.bf16.mxu1 %v2183_v0 }
 0x727   :  { %1882 = vmatpush3.bf16.msra.mxu1 %v2294_v57 }
 0x728   :  { %1887 = vmatprep.subr.bf16.mxu1 %v2183_v0 }
 0x7e5   :  { %v617_v42 = vpop.f32.mrb[12].mxu1 }
 0x7e6   :  { %v1845_v43 = vpop.f32.mrb[13].mxu1  ;;  %v623_v51 = vadd.f32 %v617_v42, %v2286_v45 }
 0x7e7   :  { %v620_v44 = vpop.f32.mrb[14].mxu1 }
 0x7e8   :  { %v1846_v46 = vpop.f32.mrb[15].mxu1 }
 0x7f5   :  { %v660_v47 = vpop.f32.mrb[16].mxu1 }
 0x7f6   :  { %v666_v48 = vadd.f32 %v660_v47, %v2335_v10  ;;  %v1857_v49 = vpop.f32.mrb[17].mxu1 }
 0x7f7   :  { %v663_v50 = vpop.f32.mrb[18].mxu1 }
 0x7f8   :  { %v668_v52 = vrot.slane %v666_v48, 6  ;;  %v1858_v53 = vpop.f32.mrb[19].mxu1 }
 0x7fa   :  { %v670_v54 = vsel %vm538_vm3, %v623_v51, %v668_v52 }
 0x7fb   :  { %2051 = vtanh.f32 %v670_v54  ;;  %v1633_v58 = vmul.f32 -1.442695, %v670_v54 }
 0x7fd   :  { %2053 = vpow2.f32 %v1633_v58 }
 0x805   :  { %v2052_v55 = vpop.eup %2051 }
 0x806   :  { %680 = vrot.lane.b32.xlu1 %v2052_v55, %s2179_s22 }
 0x807   :  { %v2054_v59 = vpop.eup %2053 }
 0x808   :  { %v674_v60 = vadd.f32 1.0, %v2054_v59 }
 0x80a   :  { %2055 = vrcp.f32 %v674_v60 }
 0x814   :  { %v2056_v61 = vpop.eup %2055 }
 0x815   :  { %v689_v5 = vmul.f32 %v2056_v61, %v563_v32  ;;  %v678_v6 = vmul.f32 %v2056_v61, %v561_v31 }
 0x878   :  { %v681_v63 = vpop.permute.xlu1 %680 }
 0x879   :  { %v683_v4 = vmul.f32 %v2056_v61, %v681_v63 }
 0x87b   :  { %685 = vrot.lane.b32.xlu0 %v683_v4, %s2186_s21 }
 0x8ed   :  { %v686_v7 = vpop.permute.xlu0 %685 }
 0x8ee   :  { %v688_v8 = vadd.f32 %v686_v7, %v678_v6  ;;  %v690_v9 = vadd.f32 %v689_v5, %v686_v7 }
 0x8f0   :  { %v691_v11 = vsel %vm538_vm3, %v688_v8, %v690_v9 }
 0x8f1   :  { %2057 = vtanh.f32 %v691_v11 }
 0x8fb   :  { %v2058_v12 = vpop.eup %2057 }
 0x8fc   :  { %694 = vrot.lane.b32.xlu1 %v2058_v12, %s2179_s22 }
 0x96e   :  { %v695_v13 = vpop.permute.xlu1 %694 }
 0x96f   :  { %v2376_v14 = vmul.f32 %v2056_v61, %v695_v13 }
 0x971   :  { %v698_v15 = vpack.c.bf16 %v2376_v14, %v2376_v14 }
 0x973   :  { %700 = vrot.lane.b32.xlu0 %v698_v15, %s2186_s21  ;;  %v702_v16 = vrot.slane %v698_v15, 1 }
 0x975   :  { %703 = vrot.lane.b32.xlu1 %v702_v16, %s2179_s22 }
 0x9e5   :  { %v701_v17 = vpop.permute.xlu0 %700 }
 0x9e6   :  { %1864 = vmatmul.mubr.msk.bf16.vlgmr.msra.gmra.mrb[8].mxu0 %vm155_vm1, %v701_v17 }
 0x9e7   :  { %1868 = vmatpush3.bf16.msra.mxu0 %v2306_v62  ;;  %1875 = vmatprep.mubr.msk.bf16.mxu0 %vm2184_vm0, %v2183_v0  ;;  %v704_v18 = vpop.permute.xlu1 %703 }
 0x9e8   :  { %1869 = vmatprep.subr.bf16.mxu0 %v2183_v0  ;;  %v707_v19 = vsel %vm155_vm1, %v701_v17, %v704_v18 }
 0x9eb   :  { %1870 = vmatpush3.bf16.msra.mxu0 %v2310_v1 }
 0x9ec   :  { %1871 = vmatprep.subr.bf16.mxu0 %v2183_v0 }
 0x9ef   :  { %1872 = vmatpush3.bf16.msra.mxu0 %v2316_v2 }
 0x9f0   :  { %1873 = vmatprep.subr.bf16.mxu0 %v2183_v0 }
 0x9f3   :  { %1874 = vmatpush3.bf16.msra.mxu0 %v2320_v3 }
 0x9f4   :  { %1899 = vmatprep.subr.bf16.mxu0 %v2183_v0 }
 0x9f6   :  { %1876 = vmatmul.mubr.msk.bf16.vlgmr.msra.gmra.mrb[12].mxu0 %vm491_vm2, %v707_v19 }
 0x9f7   :  { %1900 = vmatpush3.bf16.msra.mxu0 %v2291_v56  ;;  %1903 = vmatprep.mubr.msk.bf16.mxu0 %vm2184_vm0, %v2183_v0 }
 0x9f8   :  { %1901 = vmatprep.subr.bf16.mxu0 %v2183_v0 }
 0x9fb   :  { %1902 = vmatpush3.bf16.msra.mxu0 %v2294_v57 }
 0x9fc   :  { %1907 = vmatprep.subr.bf16.mxu0 %v2183_v0 }
 0xab9   :  { %v744_v21 = vpop.f32.mrb[8].mxu0 }
 0xaba   :  { %v1865_v22 = vpop.f32.mrb[9].mxu0  ;;  %v750_v29 = vadd.f32 %v744_v21, %v2286_v45 }
 0xabb   :  { %v747_v23 = vpop.f32.mrb[10].mxu0 }
 0xabc   :  { %v1866_v24 = vpop.f32.mrb[11].mxu0 }
 0xac9   :  { %v787_v25 = vpop.f32.mrb[12].mxu0 }
 0xaca   :  { %v793_v26 = vadd.f32 %v787_v25, %v2335_v10  ;;  %v1877_v27 = vpop.f32.mrb[13].mxu0 }
 0xacb   :  { %v790_v28 = vpop.f32.mrb[14].mxu0 }
 0xacc   :  { %v795_v30 = vrot.slane %v793_v26, 6  ;;  %v1878_v31 = vpop.f32.mrb[15].mxu0 }
 0xace   :  { %v797_v32 = vsel %vm538_vm3, %v750_v29, %v795_v30 }
 0xacf   :  { %2059 = vtanh.f32 %v797_v32  ;;  %v1636_v34 = vmul.f32 -1.442695, %v797_v32 }
 0xad1   :  { %2061 = vpow2.f32 %v1636_v34 }
 0xad9   :  { %v2060_v33 = vpop.eup %2059 }
 0xada   :  { %807 = vrot.lane.b32.xlu0 %v2060_v33, %s2179_s22 }
 0xadb   :  { %v2062_v35 = vpop.eup %2061 }
 0xadc   :  { %v801_v37 = vadd.f32 1.0, %v2062_v35 }
 0xade   :  { %2063 = vrcp.f32 %v801_v37 }
 0xae8   :  { %v2064_v38 = vpop.eup %2063 }
 0xae9   :  { %v816_v41 = vmul.f32 %v2064_v38, %v690_v9  ;;  %v805_v42 = vmul.f32 %v2064_v38, %v688_v8 }
 0xb4c   :  { %v808_v39 = vpop.permute.xlu0 %807 }
 0xb4d   :  { %v810_v40 = vmul.f32 %v2064_v38, %v808_v39 }
 0xb4f   :  { %812 = vrot.lane.b32.xlu1 %v810_v40, %s2186_s21 }
 0xbc1   :  { %v813_v43 = vpop.permute.xlu1 %812 }
 0xbc2   :  { %v815_v44 = vadd.f32 %v813_v43, %v805_v42  ;;  %v817_v46 = vadd.f32 %v816_v41, %v813_v43 }
 0xbc4   :  { %v818_v47 = vsel %vm538_vm3, %v815_v44, %v817_v46 }
 0xbc5   :  { %2065 = vtanh.f32 %v818_v47 }
 0xbcf   :  { %v2066_v48 = vpop.eup %2065 }
 0xbd0   :  { %821 = vrot.lane.b32.xlu0 %v2066_v48, %s2179_s22 }
 0xc42   :  { %v822_v49 = vpop.permute.xlu0 %821 }
 0xc43   :  { %v2408_v50 = vmul.f32 %v2064_v38, %v822_v49 }
 0xc45   :  { %v825_v51 = vpack.c.bf16 %v2408_v50, %v2408_v50 }
 0xc47   :  { %827 = vrot.lane.b32.xlu1 %v825_v51, %s2186_s21  ;;  %v829_v52 = vrot.slane %v825_v51, 1 }
 0xc49   :  { %830 = vrot.lane.b32.xlu0 %v829_v52, %s2179_s22 }
 0xcb9   :  { %v828_v53 = vpop.permute.xlu1 %827 }
 0xcba   :  { %1884 = vmatmul.mubr.msk.bf16.vlgmr.msra.gmra.mrb[20].mxu1 %vm155_vm1, %v828_v53 }
 0xcbb   :  { %1888 = vmatpush3.bf16.msra.mxu1 %v2306_v62  ;;  %1895 = vmatprep.mubr.msk.bf16.mxu1 %vm2184_vm0, %v2183_v0  ;;  %v831_v54 = vpop.permute.xlu0 %830 }
 0xcbc   :  { %1889 = vmatprep.subr.bf16.mxu1 %v2183_v0  ;;  %v834_v55 = vsel %vm155_vm1, %v828_v53, %v831_v54 }
 0xcbf   :  { %1890 = vmatpush3.bf16.msra.mxu1 %v2310_v1 }
 0xcc0   :  { %1891 = vmatprep.subr.bf16.mxu1 %v2183_v0 }
 0xcc3   :  { %1892 = vmatpush3.bf16.msra.mxu1 %v2316_v2 }
 0xcc4   :  { %1893 = vmatprep.subr.bf16.mxu1 %v2183_v0 }
 0xcc7   :  { %1894 = vmatpush3.bf16.msra.mxu1 %v2320_v3 }
 0xcc8   :  { %1919 = vmatprep.subr.bf16.mxu1 %v2183_v0 }
 0xcca   :  { %1896 = vmatmul.mubr.msk.bf16.vlgmr.msra.gmra.mrb[24].mxu1 %vm491_vm2, %v834_v55 }
 0xccb   :  { %1920 = vmatpush3.bf16.msra.mxu1 %v2291_v56  ;;  %1923 = vmatprep.mubr.msk.bf16.mxu1 %vm2184_vm0, %v2183_v0 }
 0xccc   :  { %1921 = vmatprep.subr.bf16.mxu1 %v2183_v0 }
 0xccf   :  { %1922 = vmatpush3.bf16.msra.mxu1 %v2294_v57 }
 0xcd0   :  { %1927 = vmatprep.subr.bf16.mxu1 %v2183_v0 }
 0xd8d   :  { %v871_v58 = vpop.f32.mrb[20].mxu1 }
 0xd8e   :  { %v1885_v59 = vpop.f32.mrb[21].mxu1  ;;  %v877_v7 = vadd.f32 %v871_v58, %v2286_v45 }
 0xd8f   :  { %v874_v60 = vpop.f32.mrb[22].mxu1 }
 0xd90   :  { %v1886_v61 = vpop.f32.mrb[23].mxu1 }
 0xd9d   :  { %v914_v63 = vpop.f32.mrb[24].mxu1 }
 0xd9e   :  { %v920_v4 = vadd.f32 %v914_v63, %v2335_v10  ;;  %v1897_v5 = vpop.f32.mrb[25].mxu1 }
 0xd9f   :  { %v917_v6 = vpop.f32.mrb[26].mxu1 }
 0xda0   :  { %v922_v8 = vrot.slane %v920_v4, 6  ;;  %v1898_v9 = vpop.f32.mrb[27].mxu1 }
 0xda2   :  { %v924_v11 = vsel %vm538_vm3, %v877_v7, %v922_v8 }
 0xda3   :  { %2067 = vtanh.f32 %v924_v11  ;;  %v1639_v13 = vmul.f32 -1.442695, %v924_v11 }
 0xda5   :  { %2069 = vpow2.f32 %v1639_v13 }
 0xdad   :  { %v2068_v12 = vpop.eup %2067 }
 0xdae   :  { %934 = vrot.lane.b32.xlu1 %v2068_v12, %s2179_s22 }
 0xdaf   :  { %v2070_v15 = vpop.eup %2069 }
 0xdb0   :  { %v928_v16 = vadd.f32 1.0, %v2070_v15 }
 0xdb2   :  { %2071 = vrcp.f32 %v928_v16 }
 0xdbc   :  { %v2072_v17 = vpop.eup %2071 }
 0xdbd   :  { %v943_v21 = vmul.f32 %v2072_v17, %v817_v46  ;;  %v932_v22 = vmul.f32 %v2072_v17, %v815_v44 }
 0xe20   :  { %v935_v18 = vpop.permute.xlu1 %934 }
 0xe21   :  { %v937_v19 = vmul.f32 %v2072_v17, %v935_v18 }
 0xe23   :  { %939 = vrot.lane.b32.xlu0 %v937_v19, %s2186_s21 }
 0xe95   :  { %v940_v23 = vpop.permute.xlu0 %939 }
 0xe96   :  { %v942_v24 = vadd.f32 %v940_v23, %v932_v22  ;;  %v944_v25 = vadd.f32 %v943_v21, %v940_v23 }
 0xe98   :  { %v945_v26 = vsel %vm538_vm3, %v942_v24, %v944_v25 }
 0xe99   :  { %2073 = vtanh.f32 %v945_v26 }
 0xea3   :  { %v2074_v27 = vpop.eup %2073 }
 0xea4   :  { %948 = vrot.lane.b32.xlu1 %v2074_v27, %s2179_s22 }
 0xf16   :  { %v949_v28 = vpop.permute.xlu1 %948 }
 0xf17   :  { %v2440_v29 = vmul.f32 %v2072_v17, %v949_v28 }
 0xf19   :  { %v952_v30 = vpack.c.bf16 %v2440_v29, %v2440_v29 }
 0xf1b   :  { %954 = vrot.lane.b32.xlu0 %v952_v30, %s2186_s21  ;;  %v956_v31 = vrot.slane %v952_v30, 1 }
 0xf1d   :  { %957 = vrot.lane.b32.xlu1 %v956_v31, %s2179_s22 }
 0xf8d   :  { %v955_v32 = vpop.permute.xlu0 %954 }
 0xf8e   :  { %1904 = vmatmul.mubr.msk.bf16.vlgmr.msra.gmra.mrb[16].mxu0 %vm155_vm1, %v955_v32 }
 0xf8f   :  { %1908 = vmatpush3.bf16.msra.mxu0 %v2306_v62  ;;  %1915 = vmatprep.mubr.msk.bf16.mxu0 %vm2184_vm0, %v2183_v0  ;;  %v958_v33 = vpop.permute.xlu1 %957 }
 0xf90   :  { %1909 = vmatprep.subr.bf16.mxu0 %v2183_v0  ;;  %v961_v34 = vsel %vm155_vm1, %v955_v32, %v958_v33 }
 0xf93   :  { %1910 = vmatpush3.bf16.msra.mxu0 %v2310_v1 }
 0xf94   :  { %1911 = vmatprep.subr.bf16.mxu0 %v2183_v0 }
 0xf97   :  { %1912 = vmatpush3.bf16.msra.mxu0 %v2316_v2 }
 0xf98   :  { %1913 = vmatprep.subr.bf16.mxu0 %v2183_v0 }
 0xf9b   :  { %1914 = vmatpush3.bf16.msra.mxu0 %v2320_v3 }
 0xf9c   :  { %1939 = vmatprep.subr.bf16.mxu0 %v2183_v0 }
 0xf9e   :  { %1916 = vmatmul.mubr.msk.bf16.vlgmr.msra.gmra.mrb[20].mxu0 %vm491_vm2, %v961_v34 }
 0xf9f   :  { %1940 = vmatpush3.bf16.msra.mxu0 %v2291_v56  ;;  %1943 = vmatprep.mubr.msk.bf16.mxu0 %vm2184_vm0, %v2183_v0 }
 0xfa0   :  { %1941 = vmatprep.subr.bf16.mxu0 %v2183_v0 }
 0xfa3   :  { %1942 = vmatpush3.bf16.msra.mxu0 %v2294_v57 }
 0xfa4   :  { %1947 = vmatprep.subr.bf16.mxu0 %v2183_v0 }
0x1061   :  { %v998_v35 = vpop.f32.mrb[16].mxu0 }
0x1062   :  { %v1905_v37 = vpop.f32.mrb[17].mxu0  ;;  %v1004_v56 = vadd.f32 %v998_v35, %v2286_v45 }
0x1063   :  { %v1001_v38 = vpop.f32.mrb[18].mxu0 }
0x1064   :  { %v1906_v39 = vpop.f32.mrb[19].mxu0 }
0x1071   :  { %v1041_v40 = vpop.f32.mrb[20].mxu0 }
0x1072   :  { %v1047_v41 = vadd.f32 %v1041_v40, %v2335_v10  ;;  %v1917_v42 = vpop.f32.mrb[21].mxu0 }
0x1073   :  { %v1044_v43 = vpop.f32.mrb[22].mxu0 }
0x1074   :  { %v1049_v44 = vrot.slane %v1047_v41, 6  ;;  %v1918_v46 = vpop.f32.mrb[23].mxu0 }
0x1076   :  { %v1051_v47 = vsel %vm538_vm3, %v1004_v56, %v1049_v44 }
0x1077   :  { %2075 = vtanh.f32 %v1051_v47  ;;  %v1642_v57 = vmul.f32 -1.442695, %v1051_v47 }
0x1079   :  { %2077 = vpow2.f32 %v1642_v57 }
0x1081   :  { %v2076_v48 = vpop.eup %2075 }
0x1082   :  { %1061 = vrot.lane.b32.xlu0 %v2076_v48, %s2179_s22 }
0x1083   :  { %v2078_v49 = vpop.eup %2077 }
0x1084   :  { %v1055_v51 = vadd.f32 1.0, %v2078_v49 }
0x1086   :  { %2079 = vrcp.f32 %v1055_v51 }
0x1090   :  { %v2080_v52 = vpop.eup %2079 }
0x1091   :  { %v1070_v55 = vmul.f32 %v2080_v52, %v944_v25  ;;  %v1059_v58 = vmul.f32 %v2080_v52, %v942_v24 }
0x10f4   :  { %v1062_v53 = vpop.permute.xlu0 %1061 }
0x10f5   :  { %v1064_v54 = vmul.f32 %v2080_v52, %v1062_v53 }
0x10f7   :  { %1066 = vrot.lane.b32.xlu1 %v1064_v54, %s2186_s21 }
0x1169   :  { %v1067_v59 = vpop.permute.xlu1 %1066 }
0x116a   :  { %v1069_v60 = vadd.f32 %v1067_v59, %v1059_v58  ;;  %v1071_v61 = vadd.f32 %v1070_v55, %v1067_v59 }
0x116c   :  { %v1072_v63 = vsel %vm538_vm3, %v1069_v60, %v1071_v61 }
0x116d   :  { %2081 = vtanh.f32 %v1072_v63 }
0x1177   :  { %v2082_v4 = vpop.eup %2081 }
0x1178   :  { %1075 = vrot.lane.b32.xlu0 %v2082_v4, %s2179_s22 }
0x11ea   :  { %v1076_v5 = vpop.permute.xlu0 %1075 }
0x11eb   :  { %v2472_v6 = vmul.f32 %v2080_v52, %v1076_v5 }
0x11ed   :  { %v1079_v7 = vpack.c.bf16 %v2472_v6, %v2472_v6 }
0x11ef   :  { %1081 = vrot.lane.b32.xlu1 %v1079_v7, %s2186_s21  ;;  %v1083_v8 = vrot.slane %v1079_v7, 1 }
0x11f1   :  { %1084 = vrot.lane.b32.xlu0 %v1083_v8, %s2179_s22 }
0x1261   :  { %v1082_v9 = vpop.permute.xlu1 %1081 }
0x1262   :  { %1924 = vmatmul.mubr.msk.bf16.vlgmr.msra.gmra.mrb[28].mxu1 %vm155_vm1, %v1082_v9 }
0x1263   :  { %1928 = vmatpush3.bf16.msra.mxu1 %v2306_v62  ;;  %1935 = vmatprep.mubr.msk.bf16.mxu1 %vm2184_vm0, %v2183_v0  ;;  %v1085_v11 = vpop.permute.xlu0 %1084 }
0x1264   :  { %1929 = vmatprep.subr.bf16.mxu1 %v2183_v0  ;;  %v1088_v12 = vsel %vm155_vm1, %v1082_v9, %v1085_v11 }
0x1267   :  { %1930 = vmatpush3.bf16.msra.mxu1 %v2310_v1 }
0x1268   :  { %1931 = vmatprep.subr.bf16.mxu1 %v2183_v0 }
0x126b   :  { %1932 = vmatpush3.bf16.msra.mxu1 %v2316_v2 }
0x126c   :  { %1933 = vmatprep.subr.bf16.mxu1 %v2183_v0 }
0x126f   :  { %1934 = vmatpush3.bf16.msra.mxu1 %v2320_v3 }
0x1270   :  { %1959 = vmatprep.subr.bf16.mxu1 %v2183_v0 }
0x1272   :  { %1936 = vmatmul.mubr.msk.bf16.vlgmr.msra.gmra.mrb[32].mxu1 %vm491_vm2, %v1088_v12 }
0x1273   :  { %1960 = vmatpush3.bf16.msra.mxu1 %v2306_v62  ;;  %1967 = vmatprep.mubr.msk.bf16.mxu1 %vm2184_vm0, %v2183_v0 }
0x1274   :  { %1961 = vmatprep.subr.bf16.mxu1 %v2183_v0 }
0x1277   :  { %1962 = vmatpush3.bf16.msra.mxu1 %v2310_v1 }
0x1278   :  { %1963 = vmatprep.subr.bf16.mxu1 %v2183_v0 }
0x127b   :  { %1964 = vmatpush3.bf16.msra.mxu1 %v2316_v2 }
0x127c   :  { %1965 = vmatprep.subr.bf16.mxu1 %v2183_v0 }
0x127f   :  { %1966 = vmatpush3.bf16.msra.mxu1 %v2320_v3 }
0x1335   :  { %v1125_v13 = vpop.f32.mrb[28].mxu1 }
0x1336   :  { %v1925_v15 = vpop.f32.mrb[29].mxu1  ;;  %v1131_v23 = vadd.f32 %v1125_v13, %v2286_v45 }
0x1337   :  { %v1128_v16 = vpop.f32.mrb[30].mxu1 }
0x1338   :  { %v1926_v17 = vpop.f32.mrb[31].mxu1 }
0x1345   :  { %v1168_v18 = vpop.f32.mrb[32].mxu1 }
0x1346   :  { %v1174_v19 = vadd.f32 %v1168_v18, %v2335_v10  ;;  %v1937_v21 = vpop.f32.mrb[33].mxu1 }
0x1347   :  { %v1171_v22 = vpop.f32.mrb[34].mxu1 }
0x1348   :  { %v1176_v24 = vrot.slane %v1174_v19, 6  ;;  %v1938_v25 = vpop.f32.mrb[35].mxu1 }
0x134a   :  { %v1178_v26 = vsel %vm538_vm3, %v1131_v23, %v1176_v24 }
0x134b   :  { %2083 = vtanh.f32 %v1178_v26  ;;  %v1645_v28 = vmul.f32 -1.442695, %v1178_v26 }
0x134d   :  { %2085 = vpow2.f32 %v1645_v28 }
0x1355   :  { %v2084_v27 = vpop.eup %2083 }
0x1356   :  { %1188 = vrot.lane.b32.xlu1 %v2084_v27, %s2179_s22 }
0x1357   :  { %v2086_v30 = vpop.eup %2085 }
0x1358   :  { %v1182_v31 = vadd.f32 1.0, %v2086_v30 }
0x135a   :  { %2087 = vrcp.f32 %v1182_v31 }
0x1364   :  { %v2088_v32 = vpop.eup %2087 }
0x1365   :  { %v1197_v35 = vmul.f32 %v2088_v32, %v1071_v61  ;;  %v1186_v37 = vmul.f32 %v2088_v32, %v1069_v60 }
0x13c8   :  { %v1189_v33 = vpop.permute.xlu1 %1188 }
0x13c9   :  { %v1191_v34 = vmul.f32 %v2088_v32, %v1189_v33 }
0x13cb   :  { %1193 = vrot.lane.b32.xlu0 %v1191_v34, %s2186_s21 }
0x143d   :  { %v1194_v38 = vpop.permute.xlu0 %1193 }
0x143e   :  { %v1196_v39 = vadd.f32 %v1194_v38, %v1186_v37  ;;  %v1198_v40 = vadd.f32 %v1197_v35, %v1194_v38  ;;  %v2019_v38 = vld [vmem:[#allocation4 + $0x100] sm:$0xff]  }
0x1440   :  { %v1199_v41 = vsel %vm538_vm3, %v1196_v39, %v1198_v40 }
0x1441   :  { %2089 = vtanh.f32 %v1199_v41 }
0x144b   :  { %v2090_v42 = vpop.eup %2089 }
0x144c   :  { %1202 = vrot.lane.b32.xlu1 %v2090_v42, %s2179_s22  ;;  %v2022_v42 = vld [vmem:[#allocation4 + $0xc8] sm:$0xff]  }
0x14be   :  { %v1203_v43 = vpop.permute.xlu1 %1202 }
0x14bf   :  { %v2507_v56 = vmul.f32 %v2088_v32, %v1203_v43  ;;  %v2023_v43 = vld [vmem:[#allocation4 + $0x110] sm:$0xff]  }
0x14c1   :  { %v1206_v44 = vpack.c.bf16 %v2507_v56, %v2507_v56 }
0x14c3   :  { %1208 = vrot.lane.b32.xlu0 %v1206_v44, %s2186_s21  ;;  %v1210_v46 = vrot.slane %v1206_v44, 1  ;;  %v2024_v44 = vld [vmem:[#allocation4 + $0xd0] sm:$0xff]  }
0x14c5   :  { %1211 = vrot.lane.b32.xlu1 %v1210_v46, %s2179_s22  ;;  %v2025_v46 = vld [vmem:[#allocation4 + $0x118] sm:$0xff]  }
0x1535   :  { %v1209_v47 = vpop.permute.xlu0 %1208 }
0x1536   :  { %1944 = vmatmul.mubr.msk.bf16.vlgmr.msra.gmra.mrb[24].mxu0 %vm155_vm1, %v1209_v47 }
0x1537   :  { %1948 = vmatpush3.bf16.msra.mxu0 %v2306_v62  ;;  %1955 = vmatprep.mubr.msk.bf16.mxu0 %vm2184_vm0, %v2183_v0  ;;  %v1212_v48 = vpop.permute.xlu1 %1211 }
0x1538   :  { %1949 = vmatprep.subr.bf16.mxu0 %v2183_v0  ;;  %v1215_v57 = vsel %vm155_vm1, %v1209_v47, %v1212_v48  ;;  %v2028_v47 = vld [vmem:[#allocation4 + $0xe0] sm:$0xff]  }
0x153b   :  { %1950 = vmatpush3.bf16.msra.mxu0 %v2310_v1 }
0x153c   :  { %1951 = vmatprep.subr.bf16.mxu0 %v2183_v0 }
0x153f   :  { %1952 = vmatpush3.bf16.msra.mxu0 %v2316_v2 }
0x1540   :  { %1953 = vmatprep.subr.bf16.mxu0 %v2183_v0 }
0x1543   :  { %1954 = vmatpush3.bf16.msra.mxu0 %v2320_v3 }
0x1544   :  { %1749 = vmatprep.subr.bf16.mxu0 %v2019_v38 }
0x1546   :  { %1956 = vmatmul.mubr.msk.bf16.vlgmr.msra.gmra.mrb[28].mxu0 %vm491_vm2, %v1215_v57 }
0x1609   :  { %v1252_v62 = vpop.f32.mrb[24].mxu0 }
0x160a   :  { %v1945_v49 = vpop.f32.mrb[25].mxu0  ;;  %v1258_v2 = vadd.f32 %v1252_v62, %v2286_v45 }
0x160b   :  { %v1255_v51 = vpop.f32.mrb[26].mxu0  ;;  %v2029_v49 = vld [vmem:[#allocation4 + $0x128] sm:$0xff]  }
0x160c   :  { %v1946_v52 = vpop.f32.mrb[27].mxu0  ;;  %v2030_v51 = vld [vmem:[#allocation4 + $0xe8] sm:$0xff]  }
0x160d   :  { %v2031_v52 = vld [vmem:[#allocation4 + $0x130] sm:$0xff]  }
0x1619   :  { %v1295_v53 = vpop.f32.mrb[28].mxu0 }
0x161a   :  { %v1301_v1 = vadd.f32 %v1295_v53, %v2335_v10  ;;  %v1957_v54 = vpop.f32.mrb[29].mxu0  ;;  %v2032_v53 = vld [vmem:[#allocation4 + $0xf0] sm:$0xff]  }
0x161b   :  { %v1298_v55 = vpop.f32.mrb[30].mxu0  ;;  %v2034_v54 = vld [vmem:[#allocation4 + $0xf8] sm:$0xff]  }
0x161c   :  { %v1303_v58 = vrot.slane %v1301_v1, 6  ;;  %v1958_v0 = vpop.f32.mrb[31].mxu0  ;;  %v2033_v1 = vld [vmem:[#allocation4 + $0x138] sm:$0xff]  }
0x161e   :  { %v1305_v59 = vsel %vm538_vm3, %v1258_v2, %v1303_v58  ;;  %v1985_v2 = vpack.i.bf16 %v2376_v14, %v2507_v56 }
0x161f   :  { %2091 = vtanh.f32 %v1305_v59  ;;  %v1648_v60 = vmul.f32 -1.442695, %v1305_v59 }
0x1621   :  { %2093 = vpow2.f32 %v1648_v60 }
0x1629   :  { %v2092_v3 = vpop.eup %2091 }
0x162a   :  { %1315 = vrot.lane.b32.xlu0 %v2092_v3, %s2179_s22 }
0x162b   :  { %v2094_v61 = vpop.eup %2093 }
0x162c   :  { %v1309_v63 = vadd.f32 1.0, %v2094_v61 }
0x162e   :  { %2095 = vrcp.f32 %v1309_v63 }
0x1638   :  { %v2096_v4 = vpop.eup %2095 }
0x1639   :  { %v1324_v8 = vmul.f32 %v2096_v4, %v1198_v40  ;;  %v1313_v45 = vmul.f32 %v2096_v4, %v1196_v39  ;;  %v2020_v39 = vld [vmem:[#allocation4 + $0xc0] sm:$0xff]   ;;  %v2021_v40 = vld [vmem:[#allocation4 + $0x108] sm:$0xff]  }
0x163a   :  { %1750 = vmatpush3.bf16.msra.mxu0 %v2020_v39 }
0x163b   :  { %1751 = vmatprep.subr.bf16.mxu0 %v2021_v40 }
0x163e   :  { %1752 = vmatpush3.bf16.msra.mxu0 %v2022_v42 }
0x163f   :  { %1753 = vmatprep.subr.bf16.mxu0 %v2023_v43 }
0x1642   :  { %1754 = vmatpush3.bf16.msra.mxu0 %v2024_v44 }
0x1643   :  { %1755 = vmatprep.subr.bf16.mxu0 %v2025_v46 }
0x169c   :  { %v1316_v5 = vpop.permute.xlu0 %1315 }
0x169d   :  { %v1318_v7 = vmul.f32 %v2096_v4, %v1316_v5 }
0x169f   :  { %1320 = vrot.lane.b32.xlu1 %v1318_v7, %s2186_s21 }
0x1711   :  { %v1321_v9 = vpop.permute.xlu1 %1320 }
0x1712   :  { %v1323_v11 = vadd.f32 %v1321_v9, %v1313_v45  ;;  %v1325_v12 = vadd.f32 %v1324_v8, %v1321_v9 }
0x1714   :  { %v1326_v13 = vsel %vm538_vm3, %v1323_v11, %v1325_v12 }
0x1715   :  { %2097 = vtanh.f32 %v1326_v13 }
0x171f   :  { %v2098_v15 = vpop.eup %2097 }
0x1720   :  { %1329 = vrot.lane.b32.xlu0 %v2098_v15, %s2179_s22 }
0x1792   :  { %v1330_v16 = vpop.permute.xlu0 %1329 }
0x1793   :  { %v1332_v17 = vmul.f32 %v2096_v4, %v1330_v16 }
0x1795   :  { %v1333_v18 = vpack.c.bf16 %v1332_v17, %v1332_v17  ;;  %v1990_v41 = vpack.i.bf16 %v2408_v50, %v1332_v17  ;;  %v1394_v50 = vrot.slane %v1325_v12, 2 }
0x1797   :  { %1335 = vrot.lane.b32.xlu1 %v1333_v18, %s2186_s21  ;;  %v1337_v19 = vrot.slane %v1333_v18, 1 }
0x1799   :  { %1338 = vrot.lane.b32.xlu0 %v1337_v19, %s2179_s22  ;;  %v1451_v19 = vsub.s32 4, %v2270_v20 }
0x1809   :  { %v1336_v21 = vpop.permute.xlu1 %1335 }
0x180b   :  { %v1339_v22 = vpop.permute.xlu0 %1338 }
0x180c   :  { %v1342_v23 = vsel %vm155_vm1, %v1336_v21, %v1339_v22  ;;  %v2107_v22 = vld [vmem:[#allocation6] sm:$0x1f] }
0x180d   :  { %1968 = vmatmul.mubr.msk.bf16.vlgmr.msra.gmra.mrb[36].mxu1 %vm491_vm2, %v1342_v23  ;;  %v1452_v23 = vrot.slane %v2107_v22, %v1451_v19 }
0x18e0   :  { %v1379_v24 = vpop.f32.mrb[36].mxu1 }
0x18e1   :  { %v1385_v25 = vadd.f32 %v1379_v24, %v2335_v10  ;;  %v1969_v26 = vpop.f32.mrb[37].mxu1  ;;  %v1980_v10 = vpack.i.bf16 %v2344_v36, %v2472_v6  ;;  %v2026_v36 = vld [vmem:[#allocation4 + $0xd8] sm:$0xff]   ;;  %v2027_v6 = vld [vmem:[#allocation4 + $0x120] sm:$0xff]  }
0x18e2   :  { %v1382_v27 = vpop.f32.mrb[38].mxu1  ;;  %1756 = vmatpush3.bf16.msra.mxu0 %v2026_v36 }
0x18e3   :  { %2099 = vtanh.f32 %v1385_v25  ;;  %v1970_v28 = vpop.f32.mrb[39].mxu1  ;;  %v1650_v31 = vmul.f32 -1.442695, %v1385_v25  ;;  %1757 = vmatprep.subr.bf16.mxu0 %v2027_v6 }
0x18e5   :  { %2101 = vpow2.f32 %v1650_v31 }
0x18e6   :  { %1758 = vmatpush3.bf16.msra.mxu0 %v2028_v47 }
0x18e7   :  { %1759 = vmatprep.subr.bf16.mxu0 %v2029_v49 }
0x18ea   :  { %1760 = vmatpush3.bf16.msra.mxu0 %v2030_v51 }
0x18eb   :  { %1761 = vmatprep.subr.bf16.mxu0 %v2031_v52 }
0x18ed   :  { %v2100_v30 = vpop.eup %2099 }
0x18ee   :  { %1398 = vrot.lane.b32.xlu1 %v2100_v30, %s2179_s22  ;;  %1762 = vmatpush3.bf16.msra.mxu0 %v2032_v53 }
0x18ef   :  { %v2102_v32 = vpop.eup %2101  ;;  %1763 = vmatprep.subr.bf16.mxu0 %v2033_v1 }
0x18f0   :  { %v1389_v33 = vadd.f32 1.0, %v2102_v32 }
0x18f2   :  { %2103 = vrcp.f32 %v1389_v33  ;;  %1764 = vmatpush3.bf16.msra.mxu0 %v2034_v54 }
0x18fc   :  { %v2104_v34 = vpop.eup %2103 }
0x18fd   :  { %v1396_v48 = vmul.f32 %v2104_v34, %v1394_v50 }
0x1960   :  { %v1399_v35 = vpop.permute.xlu1 %1398 }
0x1961   :  { %v1401_v37 = vmul.f32 %v2104_v34, %v1399_v35 }
0x1963   :  { %1403 = vrot.lane.b32.xlu0 %v1401_v37, %s2186_s21 }
0x1967   :  { %1981 = vrot.lane.b32.xlu0 %v1980_v10, %s2186_s21 }
0x196b   :  { %1991 = vrot.lane.b32.xlu0 %v1990_v41, %s2185_s2 }
0x19d5   :  { %v1404_v57 = vpop.permute.xlu0 %1403 }
0x19d6   :  { %v1406_v62 = vadd.f32 %v1404_v57, %v1396_v48 }
0x19d8   :  { %2105 = vtanh.f32 %v1406_v62 }
0x19d9   :  { %v1982_v58 = vpop.permute.xlu0 %1981 }
0x19da   :  { %v1984_v61 = vunpack.i.h.bf16 %v1982_v58  ;;  %v1983_v63 = vunpack.i.l.bf16 %v1982_v58 }
0x19dd   :  { %v1992_v59 = vpop.permute.xlu0 %1991 }
0x19de   :  { %v1994_v7 = vunpack.i.h.bf16 %v1992_v59  ;;  %v1993_v8 = vunpack.i.l.bf16 %v1992_v59 }
0x19e2   :  { %v2106_v55 = vpop.eup %2105 }
0x19e3   :  { %1409 = vrot.lane.b32.xlu1 %v2106_v55, %s2179_s22 }
0x19e7   :  { %1986 = vrot.lane.b32.xlu1 %v1985_v2, %s2179_s22 }
0x1a55   :  { %v1410_v0 = vpop.permute.xlu1 %1409 }
0x1a56   :  { %v1412_v3 = vmul.f32 %v2104_v34, %v1410_v0 }
0x1a58   :  { %v1438_v45 = vrot.slane %v1412_v3, 6 }
0x1a59   :  { %v1987_v60 = vpop.permute.xlu1 %1986 }
0x1a5a   :  { %v1989_v4 = vunpack.i.h.bf16 %v1987_v60  ;;  %v1988_v5 = vunpack.i.l.bf16 %v1987_v60 }
0x1a5c   :  { %v1440_v9 = vsel %vm155_vm1, %v1984_v61, %v1989_v4  ;;  %v1444_v11 = vsel %vm155_vm1, %v1983_v63, %v1988_v5 }
0x1a5d   :  { %v1441_v14 = vsel %vm491_vm2, %v1440_v9, %v1994_v7  ;;  %v1445_v56 = vsel %vm491_vm2, %v1444_v11, %v1993_v8 }
0x1a5e   :  { %v1446_v12 = vsel %vm1442_vm4, %v1445_v56, %v1438_v45  ;;  %v1443_v13 = vsel %vm1442_vm4, %v1441_v14, %v2440_v29 }
0x1a5f   :  { %v1448_v15 = vpack.c.bf16 %v1446_v12, %v1446_v12  ;;  %v1447_v16 = vpack.c.bf16 %v1443_v13, %v1443_v13 }
0x1a61   :  { %v1456_v17 = vrot.slane %v1448_v15, 1  ;;  %v1455_v18 = vrot.slane %v1447_v16, 1 }
0x1a63   :  { %1587 = vmatprep.mubr.bf16.mxu0 %v1456_v17 }
0x1a64   :  { %1588 = vmatmul.mubr.bf16.vlgmr.msra.gmra.mrb[32].mxu0 %v1455_v18 }
0x1b37   :  { %v1765_v21 = vpop.f32.mrb[32].mxu0 }
0x1b38   :  { %v1766_v24 = vpop.f32.mrb[33].mxu0 }
0x1b39   :  { %v1767_v25 = vadd.f32 %v1766_v24, %v1765_v21  ;;  %v1768_v26 = vpop.f32.mrb[34].mxu0 }
0x1b3a   :  { %v1769_v27 = vpop.f32.mrb[35].mxu0 }
0x1b3b   :  { %v1590_v28 = vadd.f32 %v1767_v25, %v1452_v23 }
0x1b3d   :  { %1595 = vst [vmem:[%s2560_s3] sm:$0x3] %v1590_v28 }
0x1b3e   :  { %1600 = vsyncpa [#allocation3], 1 }
0x1b3f   :  { %1601 = vsyncpa [#allocation5], 1 }

</bundles_post_ra>
